<compile_context>
chip_gen: v6e
topology: v6e:2x2x1
jax: 0.10.0
libtpu: 0.0.40
codegen_flags: <defaults>
</compile_context>

<pallas_src>
import functools

import jax
import jax.numpy as jnp
import numpy as np
from jax.experimental import pallas as pl
from jax.experimental.pallas import tpu as pltpu


# ----------------------------------------------------------------------------
# Fused kernel: global-avg-pool (tiled reduction) -> squeeze/excite MLP -> sigmoid
# ----------------------------------------------------------------------------
def _channel_gate_kernel(x_ref, w1_ref, b1_ref, w2_ref, b2_ref, o_ref, acc_ref,
                         *, inv_hw):
    k = pl.program_id(0)

    @pl.when(k == 0)
    def _():
        acc_ref[...] = jnp.zeros_like(acc_ref)

    # Partial spatial sum of this (N, C, THW) tile (XLU lane reduce, f32 accumulation).
    acc_ref[...] += jnp.sum(x_ref[...].astype(jnp.float32), axis=-1)

    @pl.when(k == pl.num_programs(0) - 1)
    def _():
        g = acc_ref[...] * inv_hw                                   # (N, C) GAP, f32
        # 1x1 convs on a 1x1 map == dense layers; bf16 MXU inputs, f32 accumulate.
        h = jnp.dot(g.astype(jnp.bfloat16), w1_ref[...],
                    preferred_element_type=jnp.float32) + b1_ref[...]
        h = jnp.maximum(h, 0.0)                                     # ReLU
        y = jnp.dot(h.astype(jnp.bfloat16), w2_ref[...],
                    preferred_element_type=jnp.float32) + b2_ref[...]
        o_ref[...] = jax.nn.sigmoid(y)                              # EUP exp, f32 out


# ----------------------------------------------------------------------------
# Wrapper
# ----------------------------------------------------------------------------
def channel_gate(x_nchw, params, *, max_tile_bytes=4 * 1024 * 1024):
    """x_nchw: (N, C, H, W) float32 (torch layout). Returns (N, C, 1, 1) channel mask."""
    n, c, h, w = x_nchw.shape
    hw = h * w
    ch = params["w1"].shape[1]                       # hidden = C // 16

    x3 = x_nchw.reshape(n, c, hw)                    # free reshape, keeps NCHW order

    # ---- spatial tile on the lane axis: multiple of 128, bounded by a VMEM budget
    row_bytes = n * c * x3.dtype.itemsize
    t_max = max(128, (max_tile_bytes // row_bytes) // 128 * 128)
    hw_pad = ((hw + 127) // 128) * 128
    thw = min(hw_pad, t_max)
    hw_pad = ((hw_pad + thw - 1) // thw) * thw
    if hw_pad != hw:
        # zero-padding leaves the spatial sum unchanged; the mean divides by true hw
        x3 = jnp.pad(x3, ((0, 0), (0, 0), (0, hw_pad - hw)))
    num_tiles = hw_pad // thw

    # ---- VMEM budget derived from the block working set (v7x-safe, <= 32 MiB)
    x_block_bytes = n * c * thw * x3.dtype.itemsize
    w_bytes = int(sum(int(np.prod(p.shape)) * p.dtype.itemsize
                      for p in (params["w1"], params["b1"],
                                params["w2"], params["b2"])))
    io_bytes = 2 * n * c * 4                          # output block + f32 accumulator
    vmem_limit = int(min(32 * 1024 * 1024,
                         max(8 * 1024 * 1024,
                             3 * x_block_bytes + 2 * w_bytes + io_bytes)))

    out = pl.pallas_call(
        functools.partial(_channel_gate_kernel, inv_hw=1.0 / float(hw)),
        out_shape=jax.ShapeDtypeStruct((n, c), jnp.float32),
        grid=(num_tiles,),
        in_specs=[
            pl.BlockSpec((n, c, thw), lambda k: (0, 0, k)),   # x tile (pipelined)
            pl.BlockSpec((c, ch), lambda k: (0, 0)),          # w1 (VMEM-resident)
            pl.BlockSpec((1, ch), lambda k: (0, 0)),          # b1
            pl.BlockSpec((ch, c), lambda k: (0, 0)),          # w2
            pl.BlockSpec((1, c), lambda k: (0, 0)),           # b2
        ],
        out_specs=pl.BlockSpec((n, c), lambda k: (0, 0)),     # lane-dense (N, C)
        scratch_shapes=[pltpu.VMEM((n, c), jnp.float32)],     # GAP accumulator
        compiler_params=pltpu.CompilerParams(
            dimension_semantics=("arbitrary",),               # spatial reduction axis
            vmem_limit_bytes=vmem_limit),
    )(x3, params["w1"], params["b1"], params["w2"], params["b2"])

    return out.reshape(n, c, 1, 1)                   # match torch output shape


# ----------------------------------------------------------------------------
# Parameters (deterministic; 1x1 Conv2d folded to GEMM form, weights in bf16)
# ----------------------------------------------------------------------------
def init_channel_gate_params(key, out_channels):
    assert out_channels % 16 == 0 and out_channels >= 16
    ch = out_channels // 16
    k1, k2, k3, k4 = jax.random.split(key, 4)
    lim1 = 1.0 / np.sqrt(out_channels)               # ~ torch Conv2d default init range
    lim2 = 1.0 / np.sqrt(ch)
    w1 = jax.random.uniform(k1, (out_channels, ch), jnp.float32, -lim1, lim1)
    b1 = jax.random.uniform(k2, (1, ch), jnp.float32, -lim1, lim1)
    w2 = jax.random.uniform(k3, (ch, out_channels), jnp.float32, -lim2, lim2)
    b2 = jax.random.uniform(k4, (1, out_channels), jnp.float32, -lim2, lim2)
    return {"w1": w1.astype(jnp.bfloat16), "b1": b1,
            "w2": w2.astype(jnp.bfloat16), "b2": b2}


# ----------------------------------------------------------------------------
# Pure-JAX reference (same bf16 matmul inputs / f32 accumulation)
# ----------------------------------------------------------------------------
def channel_gate_reference(x_nchw, params):
    g = jnp.mean(x_nchw.astype(jnp.float32), axis=(2, 3))            # (N, C)
    h = jnp.dot(g.astype(jnp.bfloat16), params["w1"],
                preferred_element_type=jnp.float32) + params["b1"]
    h = jnp.maximum(h, 0.0)
    y = jnp.dot(h.astype(jnp.bfloat16), params["w2"],
                preferred_element_type=jnp.float32) + params["b2"]
    return jax.nn.sigmoid(y).reshape(x_nchw.shape[0], x_nchw.shape[1], 1, 1)


if __name__ == "__main__":
    key = jax.random.PRNGKey(0)
    pkey, xkey = jax.random.split(key)

    C = 256                                           # AP-CNN instantiates ChannelGate(256)
    params = init_channel_gate_params(pkey, C)
    x = jax.random.normal(xkey, (2, C, 16, 16), jnp.float32)   # NCHW like torch

    fwd = jax.jit(channel_gate)
    out = fwd(x, params)
    jax.block_until_ready(out)

    ref = channel_gate_reference(x, params)
    assert out.shape == (2, C, 1, 1)
    np.testing.assert_allclose(np.asarray(out), np.asarray(ref), atol=2e-2, rtol=2e-2)
    print("KERNEL_OK")
</pallas_src>

<mosaic_0001>
module attributes {stable_mosaic.version = 11 : i64} {
  func.func @_channel_gate_kernel(%arg0: i32, %arg1: memref<2x256x256xf32, #tpu.memory_space<vmem>>, %arg2: memref<256x16xbf16, #tpu.memory_space<vmem>>, %arg3: memref<1x16xf32, #tpu.memory_space<vmem>>, %arg4: memref<16x256xbf16, #tpu.memory_space<vmem>>, %arg5: memref<1x256xf32, #tpu.memory_space<vmem>>, %arg6: memref<2x256xf32, #tpu.memory_space<vmem>>, %arg7: memref<2x256xf32, #tpu.memory_space<vmem>>) attributes {dimension_semantics = [#tpu.dimension_semantics<arbitrary>], iteration_bounds = array<i64: 1>, scalar_prefetch = 0 : i64, scratch_operands = 1 : i64, tpu.core_type = #tpu.core_type<tc>, window_params = [{transform_indices = @transform_0, window_bounds = array<i64: 2, 256, 256>}, {pipeline_mode = #tpu.pipeline_mode<synchronous>, transform_indices = @transform_1, window_bounds = array<i64: 256, 16>}, {pipeline_mode = #tpu.pipeline_mode<synchronous>, transform_indices = @transform_2, window_bounds = array<i64: 1, 16>}, {pipeline_mode = #tpu.pipeline_mode<synchronous>, transform_indices = @transform_3, window_bounds = array<i64: 16, 256>}, {pipeline_mode = #tpu.pipeline_mode<synchronous>, transform_indices = @transform_4, window_bounds = array<i64: 1, 256>}, {pipeline_mode = #tpu.pipeline_mode<synchronous>, transform_indices = @transform_5, window_bounds = array<i64: 2, 256>}]} {
    %c0_i32 = arith.constant 0 : i32
    %0 = arith.cmpi eq, %arg0, %c0_i32 : i32
    %1 = arith.extui %0 : i1 to i32
    %c0_i32_0 = arith.constant 0 : i32
    %2 = arith.cmpi ne, %1, %c0_i32_0 : i32
    scf.if %2 {
      %cst_9 = arith.constant 0.000000e+00 : f32
      %11 = vector.broadcast %cst_9 : f32 to vector<2x256xf32>
      %c0_10 = arith.constant 0 : index
      %c0_11 = arith.constant 0 : index
      %12 = vector.load %arg7[%c0_10, %c0_11] : memref<2x256xf32, #tpu.memory_space<vmem>>, vector<2x256xf32>
      tpu.vector_store %arg7[%c0_10, %c0_11], %11 {strides = array<i32>} : memref<2x256xf32, #tpu.memory_space<vmem>>, vector<2x256xf32>,
    } else {
    }
    %c0 = arith.constant 0 : index
    %c0_1 = arith.constant 0 : index
    %3 = vector.load %arg7[%c0, %c0_1] : memref<2x256xf32, #tpu.memory_space<vmem>>, vector<2x256xf32>
    %c0_2 = arith.constant 0 : index
    %c0_3 = arith.constant 0 : index
    %c0_4 = arith.constant 0 : index
    %4 = vector.load %arg1[%c0_2, %c0_3, %c0_4] : memref<2x256x256xf32, #tpu.memory_space<vmem>>, vector<2x256x256xf32>
    %cst = arith.constant dense<0.000000e+00> : vector<2x256xf32>
    %5 = vector.multi_reduction <add>, %4, %cst [2] : vector<2x256x256xf32> to vector<2x256xf32>
    %6 = arith.addf %3, %5 : vector<2x256xf32>
    %c0_5 = arith.constant 0 : index
    %c0_6 = arith.constant 0 : index
    %7 = vector.load %arg7[%c0_5, %c0_6] : memref<2x256xf32, #tpu.memory_space<vmem>>, vector<2x256xf32>
    tpu.vector_store %arg7[%c0_5, %c0_6], %6 {strides = array<i32>} : memref<2x256xf32, #tpu.memory_space<vmem>>, vector<2x256xf32>,
    %c0_i32_7 = arith.constant 0 : i32
    %8 = arith.cmpi eq, %arg0, %c0_i32_7 : i32
    %9 = arith.extui %8 : i1 to i32
    %c0_i32_8 = arith.constant 0 : i32
    %10 = arith.cmpi ne, %9, %c0_i32_8 : i32
    scf.if %10 {
      %c0_9 = arith.constant 0 : index
      %c0_10 = arith.constant 0 : index
      %11 = vector.load %arg7[%c0_9, %c0_10] : memref<2x256xf32, #tpu.memory_space<vmem>>, vector<2x256xf32>
      %cst_11 = arith.constant 3.906250e-03 : f32
      %12 = vector.broadcast %cst_11 : f32 to vector<2x256xf32>
      %13 = arith.mulf %11, %12 : vector<2x256xf32>
      %14 = arith.truncf %13 : vector<2x256xf32> to vector<2x256xbf16>
      %c0_12 = arith.constant 0 : index
      %c0_13 = arith.constant 0 : index
      %15 = vector.load %arg2[%c0_12, %c0_13] : memref<256x16xbf16, #tpu.memory_space<vmem>>, vector<256x16xbf16>
      %cst_14 = arith.constant dense<0.000000e+00> : vector<2x16xf32>
      %16 = tpu.matmul %14, %15, %cst_14 {dimension_numbers = #tpu.dot_dimension_numbers<[1], [0], [0], [1], [0, 0, 1, 1], [], []>} : vector<2x256xbf16>, vector<256x16xbf16>, vector<2x16xf32> -> vector<2x16xf32>
      %c0_15 = arith.constant 0 : index
      %c0_16 = arith.constant 0 : index
      %17 = vector.load %arg3[%c0_15, %c0_16] : memref<1x16xf32, #tpu.memory_space<vmem>>, vector<1x16xf32>
      %18 = vector.broadcast %17 : vector<1x16xf32> to vector<2x16xf32>
      %19 = arith.addf %16, %18 : vector<2x16xf32>
      %cst_17 = arith.constant 0.000000e+00 : f32
      %20 = vector.broadcast %cst_17 : f32 to vector<2x16xf32>
      %21 = arith.maximumf %19, %20 : vector<2x16xf32>
      %22 = arith.truncf %21 : vector<2x16xf32> to vector<2x16xbf16>
      %c0_18 = arith.constant 0 : index
      %c0_19 = arith.constant 0 : index
      %23 = vector.load %arg4[%c0_18, %c0_19] : memref<16x256xbf16, #tpu.memory_space<vmem>>, vector<16x256xbf16>
      %cst_20 = arith.constant dense<0.000000e+00> : vector<2x256xf32>
      %24 = tpu.matmul %22, %23, %cst_20 {dimension_numbers = #tpu.dot_dimension_numbers<[1], [0], [0], [1], [0, 0, 1, 1], [], []>} : vector<2x16xbf16>, vector<16x256xbf16>, vector<2x256xf32> -> vector<2x256xf32>
      %c0_21 = arith.constant 0 : index
      %c0_22 = arith.constant 0 : index
      %25 = vector.load %arg5[%c0_21, %c0_22] : memref<1x256xf32, #tpu.memory_space<vmem>>, vector<1x256xf32>
      %26 = vector.broadcast %25 : vector<1x256xf32> to vector<2x256xf32>
      %27 = arith.addf %24, %26 : vector<2x256xf32>
      %28 = arith.negf %27 : vector<2x256xf32>
      %29 = math.exp %28 : vector<2x256xf32>
      %cst_23 = arith.constant 1.000000e+00 : f32
      %30 = vector.broadcast %cst_23 : f32 to vector<2x256xf32>
      %31 = arith.addf %30, %29 : vector<2x256xf32>
      %32 = arith.divf %30, %31 : vector<2x256xf32>
      %c0_24 = arith.constant 0 : index
      %c0_25 = arith.constant 0 : index
      %33 = vector.load %arg6[%c0_24, %c0_25] : memref<2x256xf32, #tpu.memory_space<vmem>>, vector<2x256xf32>
      tpu.vector_store %arg6[%c0_24, %c0_25], %32 {strides = array<i32>} : memref<2x256xf32, #tpu.memory_space<vmem>>, vector<2x256xf32>,
    } else {
    }
    return
  }
  func.func @transform_0(%arg0: i32) -> (i32, i32, i32) {
    %c0_i32 = arith.constant 0 : i32
    %c0_i32_0 = arith.constant 0 : i32
    %c0_i32_1 = arith.constant 0 : i32
    return %c0_i32, %c0_i32_0, %arg0 : i32, i32, i32
  }
  func.func @transform_1(%arg0: i32) -> (i32, i32) {
    %c0_i32 = arith.constant 0 : i32
    %c0_i32_0 = arith.constant 0 : i32
    %c0_i32_1 = arith.constant 0 : i32
    return %c0_i32, %c0_i32_0 : i32, i32
  }
  func.func @transform_2(%arg0: i32) -> (i32, i32) {
    %c0_i32 = arith.constant 0 : i32
    %c0_i32_0 = arith.constant 0 : i32
    %c0_i32_1 = arith.constant 0 : i32
    return %c0_i32, %c0_i32_0 : i32, i32
  }
  func.func @transform_3(%arg0: i32) -> (i32, i32) {
    %c0_i32 = arith.constant 0 : i32
    %c0_i32_0 = arith.constant 0 : i32
    %c0_i32_1 = arith.constant 0 : i32
    return %c0_i32, %c0_i32_0 : i32, i32
  }
  func.func @transform_4(%arg0: i32) -> (i32, i32) {
    %c0_i32 = arith.constant 0 : i32
    %c0_i32_0 = arith.constant 0 : i32
    %c0_i32_1 = arith.constant 0 : i32
    return %c0_i32, %c0_i32_0 : i32, i32
  }
  func.func @transform_5(%arg0: i32) -> (i32, i32) {
    %c0_i32 = arith.constant 0 : i32
    %c0_i32_0 = arith.constant 0 : i32
    %c0_i32_1 = arith.constant 0 : i32
    return %c0_i32, %c0_i32_0 : i32, i32
  }
}

</mosaic_0001>

<bundles_post_ra>
// kernel: channel_gate.1
= control target key start
LH: loop header
LB: loop body
LE: loop exit
PB: predicated region body
PF: predicated region fallthrough
CT: control target
= control target key end

     0   :  { %v4218_v35 = vmov 0   ;;  %vm3494_vm0 = vcmask 130112   ;;  %vm3501_vm1 = vcmask 195712   ;;  %vm3508_vm2 = vcmask 261312   ;;  %s5772_s0 = inlined_call_operand.vmem [shape: f32[2,256,256], index: 0, kind: input, shape index: {}]   ;;  %s5773_s1 = inlined_call_operand.vmem [shape: bf16[256,16], index: 1, kind: input, shape index: {}]   ;;  %s5774_s3 = inlined_call_operand.vmem [shape: bf16[16,256], index: 3, kind: input, shape index: {}]   ;;  %s5775_s2 = inlined_call_operand.vmem [shape: f32[1,16], index: 2, kind: input, shape index: {}]   ;;  %s5776_s4 = inlined_call_operand.vmem [shape: f32[1,256], index: 4, kind: input, shape index: {}]   ;;  %s5777_s5 = inlined_call_operand.vmem [shape: f32[2,256], index: 5, kind: output, shape index: {}]  }
   0x1   :  { %v59_v0 = vld [vmem:[%s5772_s0 + $0x100] sm:$0xff]  ;;  %v60_v1 = vld [vmem:[%s5772_s0 + $0x108] sm:$0xff]  ;;  %v61_v5 = vld [vmem:[%s5772_s0 + $0x110] sm:$0xff]  ;;  %4189 = vset.pattern.permute.xlu0 %v4218_v35  ;;  %4190 = vset.pattern.permute.xlu1 %v4218_v35  ;;  %vm3515_vm3 = vcmask 326912   ;;  %vm3522_vm4 = vcmask 392512   ;;  %vm3529_vm5 = vcmask 458112  }
   0x2   :  { %v27_v2 = vld [vmem:[%s5772_s0] sm:$0xff]  ;;  %v203_v3 = vadd.f32 %v60_v1, %v59_v0  ;;  %v28_v4 = vld [vmem:[%s5772_s0 + $0x8] sm:$0xff]  ;;  %v62_v6 = vld [vmem:[%s5772_s0 + $0x118] sm:$0xff]  ;;  %4100 = vmatprep.mubr.bf16.mxu1 %v4218_v35  ;;  %vm3536_vm6 = vcmask 523712   ;;  %vm3543_vm7 = vcmask 589312   ;;  %vm3550_vm8 = vcmask 654912  }
   0x3   :  { %v155_v7 = vadd.f32 %v28_v4, %v27_v2  ;;  %v29_v8 = vld [vmem:[%s5772_s0 + $0x10] sm:$0xff]  ;;  %v30_v9 = vld [vmem:[%s5772_s0 + $0x18] sm:$0xff]  ;;  %v206_v10 = vadd.f32 %v62_v6, %v61_v5  ;;  %v91_v14 = vld [vmem:[%s5772_s0 + $0x200] sm:$0xff]  ;;  %vm3557_vm9 = vcmask 720512   ;;  %vm3564_vm10 = vcmask 786112  }
   0x4   :  { %204 = vadd.xlane.f32.xlu1 %v203_v3  ;;  %v158_v11 = vadd.f32 %v30_v9, %v29_v8  ;;  %v93_v12 = vld [vmem:[%s5772_s0 + $0x210] sm:$0xff]  ;;  %v94_v13 = vld [vmem:[%s5772_s0 + $0x218] sm:$0xff]  ;;  %v92_v15 = vld [vmem:[%s5772_s0 + $0x208] sm:$0xff]  ;;  %vm3571_vm11 = vcmask 851712   ;;  %vm3578_vm12 = vcmask 917312   ;;  %vm3585_vm13 = vcmask 982912  }
   0x5   :  { %156 = vadd.xlane.f32.xlu0 %v155_v7  ;;  %v254_v16 = vadd.f32 %v94_v13, %v93_v12  ;;  %v251_v17 = vadd.f32 %v92_v15, %v91_v14  ;;  %v125_v18 = vld [vmem:[%s5772_s0 + $0x310] sm:$0xff]  ;;  %v126_v19 = vld [vmem:[%s5772_s0 + $0x318] sm:$0xff]  ;;  %v123_v20 = vld [vmem:[%s5772_s0 + $0x300] sm:$0xff]  ;;  %vm3592_vm14 = vcmask 1048512   ;;  %vm3831_vm15 = vcmask 1041409  }
   0x6   :  { %v124_v21 = vld [vmem:[%s5772_s0 + $0x308] sm:$0xff]  ;;  %v302_v22 = vadd.f32 %v126_v19, %v125_v18  ;;  %v63_v24 = vld [vmem:[%s5772_s0 + $0x120] sm:$0xff]  ;;  %v65_v37 = vld [vmem:[%s5772_s0 + $0x130] sm:$0xff] }
   0x7   :  { %v299_v23 = vadd.f32 %v124_v21, %v123_v20  ;;  %v64_v25 = vld [vmem:[%s5772_s0 + $0x128] sm:$0xff]  ;;  %v31_v26 = vld [vmem:[%s5772_s0 + $0x20] sm:$0xff]  ;;  %v66_v38 = vld [vmem:[%s5772_s0 + $0x138] sm:$0xff] }
   0x8   :  { %207 = vadd.xlane.f32.xlu1 %v206_v10  ;;  %v32_v27 = vld [vmem:[%s5772_s0 + $0x28] sm:$0xff]  ;;  %v209_v28 = vadd.f32 %v64_v25, %v63_v24  ;;  %v127_v30 = vld [vmem:[%s5772_s0 + $0x320] sm:$0xff]  ;;  %v33_v39 = vld [vmem:[%s5772_s0 + $0x30] sm:$0xff]  ;;  %v212_v41 = vadd.f32 %v66_v38, %v65_v37 }
   0x9   :  { %159 = vadd.xlane.f32.xlu0 %v158_v11  ;;  %v161_v29 = vadd.f32 %v32_v27, %v31_v26  ;;  %v128_v31 = vld [vmem:[%s5772_s0 + $0x328] sm:$0xff]  ;;  %v95_v32 = vld [vmem:[%s5772_s0 + $0x220] sm:$0xff]  ;;  %v34_v40 = vld [vmem:[%s5772_s0 + $0x38] sm:$0xff] }
   0xa   :  { %v96_v33 = vld [vmem:[%s5772_s0 + $0x228] sm:$0xff]  ;;  %v305_v34 = vadd.f32 %v128_v31, %v127_v30  ;;  %v164_v42 = vadd.f32 %v34_v40, %v33_v39  ;;  %v129_v43 = vld [vmem:[%s5772_s0 + $0x330] sm:$0xff]  ;;  %v130_v44 = vld [vmem:[%s5772_s0 + $0x338] sm:$0xff] }
   0xb   :  { %v257_v36 = vadd.f32 %v96_v33, %v95_v32  ;;  %v97_v45 = vld [vmem:[%s5772_s0 + $0x230] sm:$0xff]  ;;  %v98_v46 = vld [vmem:[%s5772_s0 + $0x238] sm:$0xff]  ;;  %v308_v47 = vadd.f32 %v130_v44, %v129_v43  ;;  %v67_v49 = vld [vmem:[%s5772_s0 + $0x140] sm:$0xff] }
   0xc   :  { %255 = vadd.xlane.f32.xlu1 %v254_v16  ;;  %v260_v48 = vadd.f32 %v98_v46, %v97_v45  ;;  %v68_v50 = vld [vmem:[%s5772_s0 + $0x148] sm:$0xff]  ;;  %v35_v51 = vld [vmem:[%s5772_s0 + $0x40] sm:$0xff]  ;;  %v69_v61 = vld [vmem:[%s5772_s0 + $0x150] sm:$0xff] }
   0xd   :  { %252 = vadd.xlane.f32.xlu0 %v251_v17  ;;  %v36_v52 = vld [vmem:[%s5772_s0 + $0x48] sm:$0xff]  ;;  %v215_v53 = vadd.f32 %v68_v50, %v67_v49  ;;  %v131_v55 = vld [vmem:[%s5772_s0 + $0x340] sm:$0xff]  ;;  %v70_v62 = vld [vmem:[%s5772_s0 + $0x158] sm:$0xff] }
   0xe   :  { %v167_v54 = vadd.f32 %v36_v52, %v35_v51  ;;  %v132_v56 = vld [vmem:[%s5772_s0 + $0x348] sm:$0xff]  ;;  %v99_v57 = vld [vmem:[%s5772_s0 + $0x240] sm:$0xff]  ;;  %v37_v63 = vld [vmem:[%s5772_s0 + $0x50] sm:$0xff]  ;;  %v218_v1 = vadd.f32 %v70_v62, %v69_v61 }
   0xf   :  { %v100_v58 = vld [vmem:[%s5772_s0 + $0x248] sm:$0xff]  ;;  %v311_v59 = vadd.f32 %v132_v56, %v131_v55  ;;  %v38_v0 = vld [vmem:[%s5772_s0 + $0x58] sm:$0xff]  ;;  %v133_v3 = vld [vmem:[%s5772_s0 + $0x350] sm:$0xff] }
  0x10   :  { %303 = vadd.xlane.f32.xlu1 %v302_v22  ;;  %v263_v60 = vadd.f32 %v100_v58, %v99_v57  ;;  %v170_v2 = vadd.f32 %v38_v0, %v37_v63  ;;  %v134_v4 = vld [vmem:[%s5772_s0 + $0x358] sm:$0xff]  ;;  %v101_v5 = vld [vmem:[%s5772_s0 + $0x250] sm:$0xff]  ;;  %v71_v9 = vld [vmem:[%s5772_s0 + $0x160] sm:$0xff] }
  0x11   :  { %300 = vadd.xlane.f32.xlu0 %v299_v23  ;;  %v102_v6 = vld [vmem:[%s5772_s0 + $0x258] sm:$0xff]  ;;  %v314_v7 = vadd.f32 %v134_v4, %v133_v3  ;;  %v72_v10 = vld [vmem:[%s5772_s0 + $0x168] sm:$0xff]  ;;  %v39_v11 = vld [vmem:[%s5772_s0 + $0x60] sm:$0xff] }
  0x12   :  { %v266_v8 = vadd.f32 %v102_v6, %v101_v5  ;;  %v40_v12 = vld [vmem:[%s5772_s0 + $0x68] sm:$0xff]  ;;  %v221_v13 = vadd.f32 %v72_v10, %v71_v9  ;;  %v135_v15 = vld [vmem:[%s5772_s0 + $0x360] sm:$0xff]  ;;  %v73_v21 = vld [vmem:[%s5772_s0 + $0x170] sm:$0xff] }
  0x13   :  { %v173_v14 = vadd.f32 %v40_v12, %v39_v11  ;;  %v136_v16 = vld [vmem:[%s5772_s0 + $0x368] sm:$0xff]  ;;  %v103_v17 = vld [vmem:[%s5772_s0 + $0x260] sm:$0xff]  ;;  %v74_v22 = vld [vmem:[%s5772_s0 + $0x178] sm:$0xff] }
  0x14   :  { %210 = vadd.xlane.f32.xlu1 %v209_v28  ;;  %v104_v18 = vld [vmem:[%s5772_s0 + $0x268] sm:$0xff]  ;;  %v317_v19 = vadd.f32 %v136_v16, %v135_v15  ;;  %v41_v23 = vld [vmem:[%s5772_s0 + $0x70] sm:$0xff]  ;;  %v42_v24 = vld [vmem:[%s5772_s0 + $0x78] sm:$0xff]  ;;  %v224_v25 = vadd.f32 %v74_v22, %v73_v21 }
  0x15   :  { %162 = vadd.xlane.f32.xlu0 %v161_v29  ;;  %v269_v20 = vadd.f32 %v104_v18, %v103_v17  ;;  %v176_v26 = vadd.f32 %v42_v24, %v41_v23  ;;  %v137_v27 = vld [vmem:[%s5772_s0 + $0x370] sm:$0xff]  ;;  %v138_v28 = vld [vmem:[%s5772_s0 + $0x378] sm:$0xff]  ;;  %v75_v33 = vld [vmem:[%s5772_s0 + $0x180] sm:$0xff] }
  0x16   :  { %v105_v29 = vld [vmem:[%s5772_s0 + $0x270] sm:$0xff]  ;;  %v106_v30 = vld [vmem:[%s5772_s0 + $0x278] sm:$0xff]  ;;  %v320_v31 = vadd.f32 %v138_v28, %v137_v27  ;;  %v43_v35 = vld [vmem:[%s5772_s0 + $0x80] sm:$0xff] }
  0x17   :  { %v272_v32 = vadd.f32 %v106_v30, %v105_v29  ;;  %v139_v39 = vld [vmem:[%s5772_s0 + $0x380] sm:$0xff]  ;;  %v140_v40 = vld [vmem:[%s5772_s0 + $0x388] sm:$0xff]  ;;  %v77_v45 = vld [vmem:[%s5772_s0 + $0x190] sm:$0xff] }
  0x18   :  { %306 = vadd.xlane.f32.xlu1 %v305_v34  ;;  %v76_v34 = vld [vmem:[%s5772_s0 + $0x188] sm:$0xff]  ;;  %v323_v43 = vadd.f32 %v140_v40, %v139_v39  ;;  %v78_v46 = vld [vmem:[%s5772_s0 + $0x198] sm:$0xff]  ;;  %v141_v51 = vld [vmem:[%s5772_s0 + $0x390] sm:$0xff] }
  0x19   :  { %258 = vadd.xlane.f32.xlu0 %v257_v36  ;;  %v44_v36 = vld [vmem:[%s5772_s0 + $0x88] sm:$0xff]  ;;  %v227_v37 = vadd.f32 %v76_v34, %v75_v33  ;;  %v230_v49 = vadd.f32 %v78_v46, %v77_v45  ;;  %v142_v52 = vld [vmem:[%s5772_s0 + $0x398] sm:$0xff]  ;;  %v79_v57 = vld [vmem:[%s5772_s0 + $0x1a0] sm:$0xff] }
  0x1a   :  { %v179_v38 = vadd.f32 %v44_v36, %v43_v35  ;;  %v326_v55 = vadd.f32 %v142_v52, %v141_v51  ;;  %v80_v58 = vld [vmem:[%s5772_s0 + $0x1a8] sm:$0xff]  ;;  %v143_v63 = vld [vmem:[%s5772_s0 + $0x3a0] sm:$0xff]  ;;  %v81_v5 = vld [vmem:[%s5772_s0 + $0x1b0] sm:$0xff] }
  0x1b   :  { %v233_v61 = vadd.f32 %v80_v58, %v79_v57  ;;  %v144_v0 = vld [vmem:[%s5772_s0 + $0x3a8] sm:$0xff]  ;;  %v82_v6 = vld [vmem:[%s5772_s0 + $0x1b8] sm:$0xff]  ;;  %v145_v11 = vld [vmem:[%s5772_s0 + $0x3b0] sm:$0xff] }
  0x1c   :  { %213 = vadd.xlane.f32.xlu1 %v212_v41  ;;  %v107_v41 = vld [vmem:[%s5772_s0 + $0x280] sm:$0xff]  ;;  %v329_v3 = vadd.f32 %v144_v0, %v143_v63  ;;  %v236_v9 = vadd.f32 %v82_v6, %v81_v5  ;;  %v146_v12 = vld [vmem:[%s5772_s0 + $0x3b8] sm:$0xff]  ;;  %v84_v18 = vld [vmem:[%s5772_s0 + $0x1c8] sm:$0xff]  ;;  %v4221_v6 = vmov 1414812756  }
  0x1d   :  { %165 = vadd.xlane.f32.xlu0 %v164_v42  ;;  %v108_v42 = vld [vmem:[%s5772_s0 + $0x288] sm:$0xff]  ;;  %v332_v15 = vadd.f32 %v146_v12, %v145_v11  ;;  %v83_v17 = vld [vmem:[%s5772_s0 + $0x1c0] sm:$0xff]  ;;  %v85_v29 = vld [vmem:[%s5772_s0 + $0x1d0] sm:$0xff] }
  0x1e   :  { %v275_v44 = vadd.f32 %v108_v42, %v107_v41  ;;  %v239_v21 = vadd.f32 %v84_v18, %v83_v17  ;;  %v147_v23 = vld [vmem:[%s5772_s0 + $0x3c0] sm:$0xff]  ;;  %v148_v24 = vld [vmem:[%s5772_s0 + $0x3c8] sm:$0xff]  ;;  %v86_v30 = vld [vmem:[%s5772_s0 + $0x1d8] sm:$0xff] }
  0x1f   :  { %v335_v27 = vadd.f32 %v148_v24, %v147_v23  ;;  %v242_v33 = vadd.f32 %v86_v30, %v85_v29  ;;  %v149_v35 = vld [vmem:[%s5772_s0 + $0x3d0] sm:$0xff]  ;;  %v150_v36 = vld [vmem:[%s5772_s0 + $0x3d8] sm:$0xff]  ;;  %v87_v41 = vld [vmem:[%s5772_s0 + $0x1e0] sm:$0xff] }
  0x20   :  { %309 = vadd.xlane.f32.xlu1 %v308_v47  ;;  %v45_v47 = vld [vmem:[%s5772_s0 + $0x90] sm:$0xff]  ;;  %v338_v39 = vadd.f32 %v150_v36, %v149_v35  ;;  %v88_v42 = vld [vmem:[%s5772_s0 + $0x1e8] sm:$0xff] }
  0x21   :  { %261 = vadd.xlane.f32.xlu0 %v260_v48  ;;  %v46_v48 = vld [vmem:[%s5772_s0 + $0x98] sm:$0xff]  ;;  %v245_v45 = vadd.f32 %v88_v42, %v87_v41 }
  0x22   :  { %v182_v50 = vadd.f32 %v46_v48, %v45_v47  ;;  %v151_v47 = vld [vmem:[%s5772_s0 + $0x3e0] sm:$0xff]  ;;  %v152_v48 = vld [vmem:[%s5772_s0 + $0x3e8] sm:$0xff] }
  0x23   :  { %v341_v51 = vadd.f32 %v152_v48, %v151_v47 }
  0x24   :  { %216 = vadd.xlane.f32.xlu1 %v215_v53  ;;  %v109_v53 = vld [vmem:[%s5772_s0 + $0x290] sm:$0xff] }
  0x25   :  { %168 = vadd.xlane.f32.xlu0 %v167_v54  ;;  %v110_v54 = vld [vmem:[%s5772_s0 + $0x298] sm:$0xff] }
  0x26   :  { %v278_v56 = vadd.f32 %v110_v54, %v109_v53  ;;  %v89_v53 = vld [vmem:[%s5772_s0 + $0x1f0] sm:$0xff]  ;;  %v90_v54 = vld [vmem:[%s5772_s0 + $0x1f8] sm:$0xff] }
  0x27   :  { %v248_v57 = vadd.f32 %v90_v54, %v89_v53 }
  0x28   :  { %312 = vadd.xlane.f32.xlu1 %v311_v59  ;;  %v47_v59 = vld [vmem:[%s5772_s0 + $0xa0] sm:$0xff] }
  0x29   :  { %264 = vadd.xlane.f32.xlu0 %v263_v60  ;;  %v48_v60 = vld [vmem:[%s5772_s0 + $0xa8] sm:$0xff] }
  0x2a   :  { %v185_v62 = vadd.f32 %v48_v60, %v47_v59  ;;  %v153_v59 = vld [vmem:[%s5772_s0 + $0x3f0] sm:$0xff]  ;;  %v154_v60 = vld [vmem:[%s5772_s0 + $0x3f8] sm:$0xff] }
  0x2b   :  { %v344_v63 = vadd.f32 %v154_v60, %v153_v59 }
  0x2c   :  { %219 = vadd.xlane.f32.xlu1 %v218_v1  ;;  %v111_v1 = vld [vmem:[%s5772_s0 + $0x2a0] sm:$0xff] }
  0x2d   :  { %171 = vadd.xlane.f32.xlu0 %v170_v2  ;;  %v112_v2 = vld [vmem:[%s5772_s0 + $0x2a8] sm:$0xff] }
  0x2e   :  { %v281_v4 = vadd.f32 %v112_v2, %v111_v1  ;;  %v414_v1 = vlaneseq  ;;  %v4219_v2 = vmov 269488144  }
  0x30   :  { %315 = vadd.xlane.f32.xlu1 %v314_v7  ;;  %v49_v7 = vld [vmem:[%s5772_s0 + $0xb0] sm:$0xff] }
  0x31   :  { %267 = vadd.xlane.f32.xlu0 %v266_v8  ;;  %v50_v8 = vld [vmem:[%s5772_s0 + $0xb8] sm:$0xff] }
  0x32   :  { %v188_v10 = vadd.f32 %v50_v8, %v49_v7  ;;  %v426_v7 = vunpack.c.l.s4 %v4221_v6  ;;  %v4222_v8 = vmov 1987475062  }
  0x34   :  { %222 = vadd.xlane.f32.xlu1 %v221_v13  ;;  %v113_v13 = vld [vmem:[%s5772_s0 + $0x2b0] sm:$0xff] }
  0x35   :  { %174 = vadd.xlane.f32.xlu0 %v173_v14  ;;  %v114_v14 = vld [vmem:[%s5772_s0 + $0x2b8] sm:$0xff] }
  0x36   :  { %v284_v16 = vadd.f32 %v114_v14, %v113_v13  ;;  %v427_v13 = vunpack.c.0.s8 %v426_v7 }
  0x38   :  { %318 = vadd.xlane.f32.xlu1 %v317_v19  ;;  %v51_v19 = vld [vmem:[%s5772_s0 + $0xc0] sm:$0xff] }
  0x39   :  { %270 = vadd.xlane.f32.xlu0 %v269_v20  ;;  %v52_v20 = vld [vmem:[%s5772_s0 + $0xc8] sm:$0xff] }
  0x3a   :  { %v191_v22 = vadd.f32 %v52_v20, %v51_v19 }
  0x3c   :  { %225 = vadd.xlane.f32.xlu1 %v224_v25  ;;  %v115_v25 = vld [vmem:[%s5772_s0 + $0x2c0] sm:$0xff] }
  0x3d   :  { %177 = vadd.xlane.f32.xlu0 %v176_v26  ;;  %v116_v26 = vld [vmem:[%s5772_s0 + $0x2c8] sm:$0xff] }
  0x3e   :  { %v287_v28 = vadd.f32 %v116_v26, %v115_v25 }
  0x40   :  { %321 = vadd.xlane.f32.xlu1 %v320_v31  ;;  %v53_v31 = vld [vmem:[%s5772_s0 + $0xd0] sm:$0xff] }
  0x41   :  { %273 = vadd.xlane.f32.xlu0 %v272_v32  ;;  %v54_v32 = vld [vmem:[%s5772_s0 + $0xd8] sm:$0xff] }
  0x42   :  { %v194_v34 = vadd.f32 %v54_v32, %v53_v31 }
  0x44   :  { %228 = vadd.xlane.f32.xlu1 %v227_v37  ;;  %v117_v37 = vld [vmem:[%s5772_s0 + $0x2d0] sm:$0xff] }
  0x45   :  { %180 = vadd.xlane.f32.xlu0 %v179_v38  ;;  %v118_v38 = vld [vmem:[%s5772_s0 + $0x2d8] sm:$0xff] }
  0x46   :  { %v290_v40 = vadd.f32 %v118_v38, %v117_v37 }
  0x48   :  { %324 = vadd.xlane.f32.xlu1 %v323_v43  ;;  %v55_v43 = vld [vmem:[%s5772_s0 + $0xe0] sm:$0xff] }
  0x49   :  { %276 = vadd.xlane.f32.xlu0 %v275_v44  ;;  %v56_v44 = vld [vmem:[%s5772_s0 + $0xe8] sm:$0xff] }
  0x4a   :  { %v197_v46 = vadd.f32 %v56_v44, %v55_v43 }
  0x4c   :  { %231 = vadd.xlane.f32.xlu1 %v230_v49  ;;  %v119_v49 = vld [vmem:[%s5772_s0 + $0x2e0] sm:$0xff] }
  0x4d   :  { %183 = vadd.xlane.f32.xlu0 %v182_v50  ;;  %v120_v50 = vld [vmem:[%s5772_s0 + $0x2e8] sm:$0xff] }
  0x4e   :  { %v293_v52 = vadd.f32 %v120_v50, %v119_v49 }
  0x50   :  { %327 = vadd.xlane.f32.xlu1 %v326_v55  ;;  %v57_v55 = vld [vmem:[%s5772_s0 + $0xf0] sm:$0xff] }
  0x51   :  { %279 = vadd.xlane.f32.xlu0 %v278_v56  ;;  %v58_v56 = vld [vmem:[%s5772_s0 + $0xf8] sm:$0xff] }
  0x52   :  { %v200_v58 = vadd.f32 %v58_v56, %v57_v55 }
  0x54   :  { %234 = vadd.xlane.f32.xlu1 %v233_v61  ;;  %v121_v61 = vld [vmem:[%s5772_s0 + $0x2f0] sm:$0xff] }
  0x55   :  { %186 = vadd.xlane.f32.xlu0 %v185_v62  ;;  %v122_v62 = vld [vmem:[%s5772_s0 + $0x2f8] sm:$0xff] }
  0x56   :  { %v296_v0 = vadd.f32 %v122_v62, %v121_v61 }
  0x58   :  { %330 = vadd.xlane.f32.xlu1 %v329_v3  ;;  %v412_v3 = vunpack.c.l.s4 %v4219_v2 }
  0x59   :  { %282 = vadd.xlane.f32.xlu0 %v281_v4  ;;  %v4220_v4 = vmov 842150450  }
  0x5a   :  { %v419_v5 = vunpack.c.l.s4 %v4220_v4  ;;  %v413_v11 = vunpack.c.0.s8 %v412_v3 }
  0x5c   :  { %237 = vadd.xlane.f32.xlu1 %v236_v9  ;;  %v433_v9 = vunpack.c.l.s4 %v4222_v8  ;;  %v420_v12 = vunpack.c.0.s8 %v419_v5 }
  0x5d   :  { %189 = vadd.xlane.f32.xlu0 %v188_v10  ;;  %v4640_v10 = vshrl.u32 %v414_v1, 7 }
  0x5e   :  { %v434_v14 = vunpack.c.0.s8 %v433_v9 }
  0x5f   :  { %v4643_v17 = vsub.s32 %v413_v11, %v4640_v10  ;;  %v4646_v18 = vsub.s32 %v420_v12, %v4640_v10  ;;  %v4649_v19 = vsub.s32 %v427_v13, %v4640_v10 }
  0x60   :  { %333 = vadd.xlane.f32.xlu1 %v332_v15  ;;  %v4223_v15 = vmov 1983009808   ;;  %v4652_v20 = vsub.s32 %v434_v14, %v4640_v10 }
  0x61   :  { %285 = vadd.xlane.f32.xlu0 %v284_v16  ;;  %v2206_v16 = vunpack.c.l.s4 %v4223_v15 }
  0x64   :  { %240 = vadd.xlane.f32.xlu1 %v239_v21  ;;  %v2207_v21 = vunpack.c.0.s8 %v2206_v16 }
  0x65   :  { %192 = vadd.xlane.f32.xlu0 %v191_v22 }
  0x66   :  { %v4663_v32 = vsub.s32 %v2207_v21, %v4640_v10 }
  0x68   :  { %336 = vadd.xlane.f32.xlu1 %v335_v27 }
  0x69   :  { %288 = vadd.xlane.f32.xlu0 %v287_v28 }
  0x6c   :  { %243 = vadd.xlane.f32.xlu1 %v242_v33 }
  0x6d   :  { %195 = vadd.xlane.f32.xlu0 %v194_v34 }
  0x70   :  { %339 = vadd.xlane.f32.xlu1 %v338_v39 }
  0x71   :  { %291 = vadd.xlane.f32.xlu0 %v290_v40 }
  0x74   :  { %246 = vadd.xlane.f32.xlu1 %v245_v45 }
  0x75   :  { %198 = vadd.xlane.f32.xlu0 %v197_v46 }
  0x78   :  { %342 = vadd.xlane.f32.xlu1 %v341_v51 }
  0x79   :  { %294 = vadd.xlane.f32.xlu0 %v293_v52 }
  0x7c   :  { %249 = vadd.xlane.f32.xlu1 %v248_v57 }
  0x7d   :  { %201 = vadd.xlane.f32.xlu0 %v200_v58 }
  0x80   :  { %345 = vadd.xlane.f32.xlu1 %v344_v63 }
  0x81   :  { %297 = vadd.xlane.f32.xlu0 %v296_v0 }
  0x8d   :  { %v205_v22 = vpop.xlane.xlu1 %204 }
  0x8e   :  { %v865_v23 = vrot.slane %v205_v22, %v4643_v17  ;;  %v872_v24 = vrot.slane %v205_v22, %v4646_v18  ;;  %v879_v25 = vrot.slane %v205_v22, %v4649_v19  ;;  %v886_v26 = vrot.slane %v205_v22, %v4652_v20  ;;  %v157_v27 = vpop.xlane.xlu0 %156 }
  0x8f   :  { %v417_v28 = vrot.slane %v157_v27, %v4643_v17  ;;  %v424_v29 = vrot.slane %v157_v27, %v4646_v18  ;;  %v431_v30 = vrot.slane %v157_v27, %v4649_v19  ;;  %v438_v31 = vrot.slane %v157_v27, %v4652_v20 }
  0x90   :  { %v2475_v36 = vcombine.low %v865_v23, %v872_v24  ;;  %v2476_v37 = vcombine.low %v879_v25, %v886_v26 }
  0x91   :  { %v208_v33 = vpop.xlane.xlu1 %207  ;;  %v2203_v34 = vcombine.low %v417_v28, %v424_v29  ;;  %v2204_v35 = vcombine.low %v431_v30, %v438_v31 }
  0x92   :  { %v893_v38 = vrot.slane %v208_v33, %v4643_v17  ;;  %v900_v39 = vrot.slane %v208_v33, %v4646_v18  ;;  %v907_v40 = vrot.slane %v208_v33, %v4649_v19  ;;  %v914_v41 = vrot.slane %v208_v33, %v4652_v20  ;;  %v160_v42 = vpop.xlane.xlu0 %159 }
  0x93   :  { %v445_v43 = vrot.slane %v160_v42, %v4643_v17  ;;  %v452_v44 = vrot.slane %v160_v42, %v4646_v18  ;;  %v459_v45 = vrot.slane %v160_v42, %v4649_v19  ;;  %v466_v46 = vrot.slane %v160_v42, %v4652_v20 }
  0x94   :  { %v2211_v47 = vrot.slane %v2203_v34, %v4663_v32  ;;  %v2218_v48 = vrot.slane %v2204_v35, %v4663_v32  ;;  %v2483_v53 = vrot.slane %v2475_v36, %v4663_v32  ;;  %v2490_v55 = vrot.slane %v2476_v37, %v4663_v32 }
  0x95   :  { %v256_v49 = vpop.xlane.xlu1 %255  ;;  %v2220_v50 = vcombine.low %v445_v43, %v452_v44  ;;  %v2221_v51 = vcombine.low %v459_v45, %v466_v46  ;;  %v2492_v56 = vcombine.low %v893_v38, %v900_v39  ;;  %v2493_v57 = vcombine.low %v907_v40, %v914_v41 }
  0x96   :  { %v253_v52 = vpop.xlane.xlu0 %252  ;;  %v2219_v54 = vcombine.low %v2211_v47, %v2218_v48  ;;  %v1341_v58 = vrot.slane %v256_v49, %v4643_v17  ;;  %v1348_v59 = vrot.slane %v256_v49, %v4646_v18  ;;  %v1355_v6 = vrot.slane %v256_v49, %v4649_v19 }
  0x97   :  { %v2228_v60 = vrot.slane %v2220_v50, %v4663_v32  ;;  %v2235_v61 = vrot.slane %v2221_v51, %v4663_v32  ;;  %v1313_v63 = vrot.slane %v253_v52, %v4643_v17  ;;  %v1320_v0 = vrot.slane %v253_v52, %v4646_v18 }
  0x98   :  { %3292 = vperm.xlu0 %4189, %v2219_v54   ;;  %v1327_v2 = vrot.slane %v253_v52, %v4649_v19  ;;  %v1334_v3 = vrot.slane %v253_v52, %v4652_v20  ;;  %v1362_v7 = vrot.slane %v256_v49, %v4652_v20  ;;  %v2491_v8 = vcombine.low %v2483_v53, %v2490_v55 }
  0x99   :  { %v4681_v62 = vpop.xlane.xlu1 %303  ;;  %v2236_v5 = vcombine.low %v2228_v60, %v2235_v61  ;;  %v2500_v9 = vrot.slane %v2492_v56, %v4663_v32  ;;  %v2507_v12 = vrot.slane %v2493_v57, %v4663_v32  ;;  %v2747_v13 = vcombine.low %v1313_v63, %v1320_v0 }
  0x9a   :  { %v301_v4 = vpop.xlane.xlu0 %300  ;;  %v2748_v14 = vcombine.low %v1327_v2, %v1334_v3  ;;  %v4691_v15 = vcombine.low %v1341_v58, %v1348_v59  ;;  %v1789_v25 = vrot.slane %v4681_v62, %v4643_v17  ;;  %v1796_v26 = vrot.slane %v4681_v62, %v4646_v18 }
  0x9b   :  { %3295 = vperm.xlu1 %4190, %v2236_v5   ;;  %v1761_v27 = vrot.slane %v301_v4, %v4643_v17  ;;  %v1768_v28 = vrot.slane %v301_v4, %v4646_v18  ;;  %v1775_v29 = vrot.slane %v301_v4, %v4649_v19  ;;  %v1782_v30 = vrot.slane %v301_v4, %v4652_v20 }
  0x9c   :  { %v1803_v34 = vrot.slane %v4681_v62, %v4649_v19  ;;  %v2508_v36 = vcombine.low %v2500_v9, %v2507_v12  ;;  %v2755_v37 = vrot.slane %v2747_v13, %v4663_v32  ;;  %v2762_v38 = vrot.slane %v2748_v14, %v4663_v32 }
  0x9d   :  { %v211_v11 = vpop.xlane.xlu1 %210  ;;  %v1810_v44 = vrot.slane %v4681_v62, %v4652_v20  ;;  %v2765_v45 = vcombine.low %v1355_v6, %v1362_v7  ;;  %v2772_v46 = vrot.slane %v4691_v15, %v4663_v32  ;;  %v3019_v47 = vcombine.low %v1761_v27, %v1768_v28 }
  0x9e   :  { %v921_v16 = vrot.slane %v211_v11, %v4643_v17  ;;  %v928_v21 = vrot.slane %v211_v11, %v4646_v18  ;;  %v935_v22 = vrot.slane %v211_v11, %v4649_v19  ;;  %v942_v23 = vrot.slane %v211_v11, %v4652_v20  ;;  %v4697_v24 = vpop.xlane.xlu0 %162 }
  0x9f   :  { %3340 = vperm.xlu1 %4190, %v2491_v8   ;;  %v3020_v51 = vcombine.low %v1775_v29, %v1782_v30  ;;  %v473_v52 = vrot.slane %v4697_v24, %v4643_v17  ;;  %v2763_v54 = vcombine.low %v2755_v37, %v2762_v38  ;;  %v4725_v56 = vcombine.low %v1789_v25, %v1796_v26 }
  0xa0   :  { %v2509_v31 = vcombine.low %v921_v16, %v928_v21  ;;  %v2510_v33 = vcombine.low %v935_v22, %v942_v23  ;;  %v480_v62 = vrot.slane %v4697_v24, %v4646_v18  ;;  %v2779_v0 = vrot.slane %v2765_v45, %v4663_v32 }
  0xa1   :  { %v307_v35 = vpop.xlane.xlu1 %306  ;;  %v3027_v2 = vrot.slane %v3019_v47, %v4663_v32  ;;  %v3034_v6 = vrot.slane %v3020_v51, %v4663_v32  ;;  %v487_v7 = vrot.slane %v4697_v24, %v4649_v19  ;;  %v494_v8 = vrot.slane %v4697_v24, %v4652_v20 }
  0xa2   :  { %v1817_v39 = vrot.slane %v307_v35, %v4643_v17  ;;  %v1824_v40 = vrot.slane %v307_v35, %v4646_v18  ;;  %v1831_v41 = vrot.slane %v307_v35, %v4649_v19  ;;  %v1838_v42 = vrot.slane %v307_v35, %v4652_v20  ;;  %v4715_v43 = vpop.xlane.xlu0 %258 }
  0xa3   :  { %v2517_v48 = vrot.slane %v2509_v31, %v4663_v32  ;;  %v2524_v49 = vrot.slane %v2510_v33, %v4663_v32  ;;  %3343 = vperm.xlu1 %4190, %v2508_v36   ;;  %v2780_v22 = vcombine.low %v2772_v46, %v2779_v0  ;;  %v3037_v23 = vcombine.low %v1803_v34, %v1810_v44 }
  0xa4   :  { %v3053_v50 = vcombine.low %v1817_v39, %v1824_v40  ;;  %v3054_v55 = vcombine.low %v1831_v41, %v1838_v42  ;;  %v3044_v24 = vrot.slane %v4725_v56, %v4663_v32  ;;  %v3035_v27 = vcombine.low %v3027_v2, %v3034_v6 }
  0xa5   :  { %v214_v53 = vpop.xlane.xlu1 %213  ;;  %v2525_v63 = vcombine.low %v2517_v48, %v2524_v49  ;;  %v2237_v31 = vcombine.low %v473_v52, %v480_v62  ;;  %v2238_v33 = vcombine.low %v487_v7, %v494_v8  ;;  %v1369_v39 = vrot.slane %v4715_v43, %v4643_v17 }
  0xa6   :  { %v949_v57 = vrot.slane %v214_v53, %v4643_v17  ;;  %v956_v58 = vrot.slane %v214_v53, %v4646_v18  ;;  %v963_v59 = vrot.slane %v214_v53, %v4649_v19  ;;  %v970_v60 = vrot.slane %v214_v53, %v4652_v20  ;;  %v4731_v61 = vpop.xlane.xlu0 %165 }
  0xa7   :  { %v3061_v3 = vrot.slane %v3053_v50, %v4663_v32  ;;  %v3068_v4 = vrot.slane %v3054_v55, %v4663_v32  ;;  %3346 = vperm.xlu0 %4189, %v2525_v63   ;;  %3388 = vperm.xlu1 %4190, %v2763_v54   ;;  %v1376_v40 = vrot.slane %v4715_v43, %v4646_v18 }
  0xa8   :  { %v2526_v5 = vcombine.low %v949_v57, %v956_v58  ;;  %v2527_v11 = vcombine.low %v963_v59, %v970_v60  ;;  %v3051_v42 = vrot.slane %v3037_v23, %v4663_v32  ;;  %v1383_v44 = vrot.slane %v4715_v43, %v4649_v19 }
  0xa9   :  { %v310_v9 = vpop.xlane.xlu1 %309  ;;  %v3069_v21 = vcombine.low %v3061_v3, %v3068_v4  ;;  %v2245_v50 = vrot.slane %v2237_v31, %v4663_v32  ;;  %v2252_v51 = vrot.slane %v2238_v33, %v4663_v32  ;;  %v1390_v57 = vrot.slane %v4715_v43, %v4652_v20 }
  0xaa   :  { %v1845_v12 = vrot.slane %v310_v9, %v4643_v17  ;;  %v1852_v13 = vrot.slane %v310_v9, %v4646_v18  ;;  %v1859_v14 = vrot.slane %v310_v9, %v4649_v19  ;;  %v1866_v15 = vrot.slane %v310_v9, %v4652_v20  ;;  %v4748_v16 = vpop.xlane.xlu0 %261 }
  0xab   :  { %v2534_v25 = vrot.slane %v2526_v5, %v4663_v32  ;;  %v2541_v26 = vrot.slane %v2527_v11, %v4663_v32  ;;  %3442 = vperm.xlu0 %4189, %v3069_v21   ;;  %3391 = vperm.xlu1 %4190, %v2780_v22   ;;  %v501_v58 = vrot.slane %v4731_v61, %v4643_v17 }
  0xac   :  { %v3070_v28 = vcombine.low %v1845_v12, %v1852_v13  ;;  %v3071_v30 = vcombine.low %v1859_v14, %v1866_v15  ;;  %v3052_v60 = vcombine.low %v3044_v24, %v3051_v42  ;;  %v508_v62 = vrot.slane %v4731_v61, %v4646_v18 }
  0xad   :  { %v217_v29 = vpop.xlane.xlu1 %216  ;;  %v2542_v41 = vcombine.low %v2534_v25, %v2541_v26  ;;  %v2253_v2 = vcombine.low %v2245_v50, %v2252_v51  ;;  %v2781_v6 = vcombine.low %v1369_v39, %v1376_v40  ;;  %v515_v12 = vrot.slane %v4731_v61, %v4649_v19 }
  0xae   :  { %v977_v35 = vrot.slane %v217_v29, %v4643_v17  ;;  %v984_v36 = vrot.slane %v217_v29, %v4646_v18  ;;  %v991_v34 = vrot.slane %v217_v29, %v4649_v19  ;;  %v998_v37 = vrot.slane %v217_v29, %v4652_v20  ;;  %v4758_v38 = vpop.xlane.xlu0 %168 }
  0xaf   :  { %v3078_v45 = vrot.slane %v3070_v28, %v4663_v32  ;;  %v3085_v46 = vrot.slane %v3071_v30, %v4663_v32  ;;  %3349 = vperm.xlu0 %4189, %v2542_v41   ;;  %3436 = vperm.xlu1 %4190, %v3035_v27   ;;  %v522_v13 = vrot.slane %v4731_v61, %v4652_v20 }
  0xb0   :  { %v2543_v47 = vcombine.low %v977_v35, %v984_v36  ;;  %v2544_v49 = vcombine.low %v991_v34, %v998_v37  ;;  %v1397_v14 = vrot.slane %v4748_v16, %v4643_v17  ;;  %v1404_v21 = vrot.slane %v4748_v16, %v4646_v18 }
  0xb1   :  { %v313_v48 = vpop.xlane.xlu1 %312  ;;  %v3086_v59 = vcombine.low %v3078_v45, %v3085_v46  ;;  %v2782_v24 = vcombine.low %v1383_v44, %v1390_v57  ;;  %v2789_v26 = vrot.slane %v2781_v6, %v4663_v32  ;;  %v1411_v61 = vrot.slane %v4748_v16, %v4649_v19 }
  0xb2   :  { %v1873_v52 = vrot.slane %v313_v48, %v4643_v17  ;;  %v1880_v53 = vrot.slane %v313_v48, %v4646_v18  ;;  %v1887_v54 = vrot.slane %v313_v48, %v4649_v19  ;;  %v1894_v55 = vrot.slane %v313_v48, %v4652_v20  ;;  %v4775_v56 = vpop.xlane.xlu0 %264 }
  0xb3   :  { %v2551_v63 = vrot.slane %v2543_v47, %v4663_v32  ;;  %v2558_v0 = vrot.slane %v2544_v49, %v4663_v32  ;;  %3445 = vperm.xlu0 %4189, %v3086_v59   ;;  %3439 = vperm.xlu1 %4190, %v3052_v60   ;;  %v1418_v29 = vrot.slane %v4748_v16, %v4652_v20 }
  0xb4   :  { %v3087_v4 = vcombine.low %v1873_v52, %v1880_v53  ;;  %v3088_v5 = vcombine.low %v1887_v54, %v1894_v55  ;;  %v529_v35 = vrot.slane %v4758_v38, %v4643_v17  ;;  %v536_v36 = vrot.slane %v4758_v38, %v4646_v18 }
  0xb5   :  { %v220_v3 = vpop.xlane.xlu1 %219  ;;  %v2559_v15 = vcombine.low %v2551_v63, %v2558_v0  ;;  %v2796_v37 = vrot.slane %v2782_v24, %v4663_v32  ;;  %v2254_v45 = vcombine.low %v501_v58, %v508_v62  ;;  %v2255_v46 = vcombine.low %v515_v12, %v522_v13 }
  0xb6   :  { %v1005_v43 = vrot.slane %v220_v3, %v4643_v17  ;;  %v1012_v7 = vrot.slane %v220_v3, %v4646_v18  ;;  %v1019_v8 = vrot.slane %v220_v3, %v4649_v19  ;;  %v1026_v9 = vrot.slane %v220_v3, %v4652_v20  ;;  %v4789_v11 = vpop.xlane.xlu0 %171 }
  0xb7   :  { %v3095_v22 = vrot.slane %v3087_v4, %v4663_v32  ;;  %v3102_v23 = vrot.slane %v3088_v5, %v4663_v32  ;;  %3352 = vperm.xlu0 %4189, %v2559_v15   ;;  %3298 = vperm.xlu1 %4190, %v2253_v2   ;;  %v2797_v42 = vcombine.low %v2789_v26, %v2796_v37 }
  0xb8   :  { %v2560_v27 = vcombine.low %v1005_v43, %v1012_v7  ;;  %v2561_v28 = vcombine.low %v1019_v8, %v1026_v9  ;;  %v543_v48 = vrot.slane %v4758_v38, %v4649_v19  ;;  %v550_v49 = vrot.slane %v4758_v38, %v4652_v20 }
  0xb9   :  { %v316_v25 = vpop.xlane.xlu1 %315  ;;  %v3103_v34 = vcombine.low %v3095_v22, %v3102_v23  ;;  %v1425_v50 = vrot.slane %v4775_v56, %v4643_v17  ;;  %v1432_v51 = vrot.slane %v4775_v56, %v4646_v18  ;;  %v2262_v55 = vrot.slane %v2254_v45, %v4663_v32 }
  0xba   :  { %v1901_v30 = vrot.slane %v316_v25, %v4643_v17  ;;  %v1908_v31 = vrot.slane %v316_v25, %v4646_v18  ;;  %v4808_v33 = vpop.xlane.xlu0 %267  ;;  %v1915_v39 = vrot.slane %v316_v25, %v4649_v19  ;;  %v1922_v40 = vrot.slane %v316_v25, %v4652_v20 }
  0xbb   :  { %v2568_v16 = vrot.slane %v2560_v27, %v4663_v32  ;;  %v2575_v41 = vrot.slane %v2561_v28, %v4663_v32  ;;  %3448 = vperm.xlu0 %4189, %v3103_v34   ;;  %3394 = vperm.xlu1 %4190, %v2797_v42   ;;  %v2269_v57 = vrot.slane %v2255_v46, %v4663_v32 }
  0xbc   :  { %v3104_v47 = vcombine.low %v1901_v30, %v1908_v31  ;;  %v3105_v62 = vcombine.low %v1915_v39, %v1922_v40  ;;  %v2798_v3 = vcombine.low %v1397_v14, %v1404_v21  ;;  %v2799_v4 = vcombine.low %v1411_v61, %v1418_v29 }
  0xbd   :  { %v223_v44 = vpop.xlane.xlu1 %222  ;;  %v2576_v54 = vcombine.low %v2568_v16, %v2575_v41  ;;  %v2270_v63 = vcombine.low %v2262_v55, %v2269_v57  ;;  %v1439_v5 = vrot.slane %v4775_v56, %v4649_v19  ;;  %v1446_v6 = vrot.slane %v4775_v56, %v4652_v20 }
  0xbe   :  { %v175_v52 = vpop.xlane.xlu0 %174  ;;  %v1033_v53 = vrot.slane %v223_v44, %v4643_v17  ;;  %v1040_v58 = vrot.slane %v223_v44, %v4646_v18  ;;  %v1047_v59 = vrot.slane %v223_v44, %v4649_v19  ;;  %v1054_v60 = vrot.slane %v223_v44, %v4652_v20 }
  0xbf   :  { %3355 = vperm.xlu0 %4189, %v2576_v54   ;;  %v3112_v2 = vrot.slane %v3104_v47, %v4663_v32  ;;  %v557_v43 = vrot.slane %v4789_v11, %v4643_v17  ;;  %v564_v7 = vrot.slane %v4789_v11, %v4646_v18  ;;  %v571_v9 = vrot.slane %v4789_v11, %v4649_v19 }
  0xc0   :  { %v578_v12 = vrot.slane %v4789_v11, %v4652_v20  ;;  %3301 = vperm.xlu1 %4190, %v2270_v63   ;;  %v3119_v13 = vrot.slane %v3105_v62, %v4663_v32  ;;  %v2806_v14 = vrot.slane %v2798_v3, %v4663_v32  ;;  %v585_v21 = vrot.slane %v175_v52, %v4643_v17 }
  0xc1   :  { %v319_v0 = vpop.xlane.xlu1 %318  ;;  %v592_v22 = vrot.slane %v175_v52, %v4646_v18  ;;  %v2813_v23 = vrot.slane %v2799_v4, %v4663_v32  ;;  %v2577_v27 = vcombine.low %v1033_v53, %v1040_v58  ;;  %v2578_v28 = vcombine.low %v1047_v59, %v1054_v60 }
  0xc2   :  { %v4842_v8 = vpop.xlane.xlu0 %270  ;;  %v1929_v15 = vrot.slane %v319_v0, %v4643_v17  ;;  %v1936_v24 = vrot.slane %v319_v0, %v4646_v18  ;;  %v3120_v25 = vcombine.low %v3112_v2, %v3119_v13  ;;  %v1453_v61 = vrot.slane %v4808_v33, %v4643_v17 }
  0xc3   :  { %v1460_v29 = vrot.slane %v4808_v33, %v4646_v18  ;;  %v1467_v30 = vrot.slane %v4808_v33, %v4649_v19  ;;  %v2814_v31 = vcombine.low %v2806_v14, %v2813_v23  ;;  %v1943_v37 = vrot.slane %v319_v0, %v4649_v19 }
  0xc4   :  { %v599_v39 = vrot.slane %v175_v52, %v4649_v19  ;;  %v606_v40 = vrot.slane %v175_v52, %v4652_v20  ;;  %3451 = vperm.xlu0 %4189, %v3120_v25   ;;  %v2585_v16 = vrot.slane %v2577_v27, %v4663_v32  ;;  %v1950_v41 = vrot.slane %v319_v0, %v4652_v20 }
  0xc5   :  { %v226_v26 = vpop.xlane.xlu1 %225  ;;  %3397 = vperm.xlu1 %4190, %v2814_v31   ;;  %v2592_v42 = vrot.slane %v2578_v28, %v4663_v32  ;;  %v2271_v44 = vcombine.low %v529_v35, %v536_v36  ;;  %v2272_v45 = vcombine.low %v543_v48, %v550_v49  ;;  %v1474_v46 = vrot.slane %v4808_v33, %v4652_v20 }
  0xc6   :  { %v4861_v34 = vpop.xlane.xlu0 %177  ;;  %v4877_v47 = vcombine.low %v585_v21, %v592_v22  ;;  %v1481_v52 = vrot.slane %v4842_v8, %v4643_v17  ;;  %v3121_v54 = vcombine.low %v1929_v15, %v1936_v24  ;;  %v1488_v55 = vrot.slane %v4842_v8, %v4646_v18 }
  0xc7   :  { %v2593_v57 = vcombine.low %v2585_v16, %v2592_v42  ;;  %v2279_v58 = vrot.slane %v2271_v44, %v4663_v32  ;;  %v2286_v38 = vrot.slane %v2272_v45, %v4663_v32  ;;  %v4887_v36 = vcombine.low %v599_v39, %v606_v40 }
  0xc8   :  { %v1061_v48 = vrot.slane %v226_v26, %v4643_v17  ;;  %v1495_v49 = vrot.slane %v4842_v8, %v4649_v19  ;;  %v1502_v59 = vrot.slane %v4842_v8, %v4652_v20  ;;  %v1068_v60 = vrot.slane %v226_v26, %v4646_v18 }
  0xc9   :  { %v322_v53 = vpop.xlane.xlu1 %321  ;;  %3358 = vperm.xlu0 %4189, %v2593_v57   ;;  %v2287_v62 = vcombine.low %v2279_v58, %v2286_v38  ;;  %v3122_v63 = vcombine.low %v1943_v37, %v1950_v41  ;;  %v3129_v0 = vrot.slane %v3121_v54, %v4663_v32  ;;  %v1075_v2 = vrot.slane %v226_v26, %v4649_v19 }
  0xca   :  { %v4885_v35 = vpop.xlane.xlu0 %273  ;;  %v1082_v3 = vrot.slane %v226_v26, %v4652_v20  ;;  %v2815_v4 = vcombine.low %v1425_v50, %v1432_v51  ;;  %v2816_v13 = vcombine.low %v1439_v5, %v1446_v6  ;;  %v4906_v14 = vcombine.low %v1481_v52, %v1488_v55 }
  0xcb   :  { %3304 = vperm.xlu1 %4190, %v2287_v62   ;;  %v613_v15 = vrot.slane %v4861_v34, %v4643_v17  ;;  %v620_v21 = vrot.slane %v4861_v34, %v4646_v18  ;;  %v3136_v22 = vrot.slane %v3122_v63, %v4663_v32  ;;  %v627_v56 = vrot.slane %v4861_v34, %v4649_v19 }
  0xcc   :  { %v634_v50 = vrot.slane %v4861_v34, %v4652_v20  ;;  %v2823_v51 = vrot.slane %v2815_v4, %v4663_v32  ;;  %v2830_v5 = vrot.slane %v2816_v13, %v4663_v32  ;;  %v1957_v6 = vrot.slane %v322_v53, %v4643_v17 }
  0xcd   :  { %v4904_v8 = vpop.xlane.xlu1 %228  ;;  %v1964_v24 = vrot.slane %v322_v53, %v4646_v18  ;;  %v3137_v25 = vcombine.low %v3129_v0, %v3136_v22  ;;  %v2594_v26 = vcombine.low %v1061_v48, %v1068_v60  ;;  %v2595_v28 = vcombine.low %v1075_v2, %v1082_v3 }
  0xce   :  { %v4913_v23 = vpop.xlane.xlu0 %180  ;;  %v2831_v27 = vcombine.low %v2823_v51, %v2830_v5  ;;  %v2288_v31 = vcombine.low %v557_v43, %v564_v7  ;;  %v2289_v34 = vcombine.low %v571_v9, %v578_v12  ;;  %v4937_v39 = vcombine.low %v1495_v49, %v1502_v59 }
  0xcf   :  { %v1971_v40 = vrot.slane %v322_v53, %v4649_v19  ;;  %v1978_v16 = vrot.slane %v322_v53, %v4652_v20  ;;  %3454 = vperm.xlu0 %4189, %v3137_v25   ;;  %v2602_v41 = vrot.slane %v2594_v26, %v4663_v32  ;;  %v4944_v43 = vcombine.low %v613_v15, %v620_v21 }
  0xd0   :  { %3400 = vperm.xlu1 %4190, %v2831_v27   ;;  %v2609_v7 = vrot.slane %v2595_v28, %v4663_v32  ;;  %v2296_v11 = vrot.slane %v2288_v31, %v4663_v32  ;;  %v2303_v9 = vrot.slane %v2289_v34, %v4663_v32  ;;  %v4949_v12 = vcombine.low %v627_v56, %v634_v50 }
  0xd1   :  { %v4935_v37 = vpop.xlane.xlu1 %324  ;;  %v1509_v44 = vrot.slane %v4885_v35, %v4643_v17  ;;  %v1516_v45 = vrot.slane %v4885_v35, %v4646_v18  ;;  %v1523_v52 = vrot.slane %v4885_v35, %v4649_v19  ;;  %v1530_v53 = vrot.slane %v4885_v35, %v4652_v20 }
  0xd2   :  { %v4942_v42 = vpop.xlane.xlu0 %276  ;;  %v2610_v54 = vcombine.low %v2602_v41, %v2609_v7  ;;  %v2304_v55 = vcombine.low %v2296_v11, %v2303_v9  ;;  %v3138_v57 = vcombine.low %v1957_v6, %v1964_v24  ;;  %v1089_v38 = vrot.slane %v4904_v8, %v4643_v17 }
  0xd3   :  { %v3139_v48 = vcombine.low %v1971_v40, %v1978_v16  ;;  %v2832_v49 = vcombine.low %v1453_v61, %v1460_v29  ;;  %v2833_v35 = vcombine.low %v1467_v30, %v1474_v46  ;;  %v1096_v60 = vrot.slane %v4904_v8, %v4646_v18 }
  0xd4   :  { %v1103_v62 = vrot.slane %v4904_v8, %v4649_v19  ;;  %3361 = vperm.xlu0 %4189, %v2610_v54   ;;  %3307 = vperm.xlu1 %4190, %v2304_v55   ;;  %v3146_v63 = vrot.slane %v3138_v57, %v4663_v32  ;;  %v4983_v61 = vand.u32 127, %v414_v1  ;;  %v1110_v29 = vrot.slane %v4904_v8, %v4652_v20 }
  0xd5   :  { %v4959_v58 = vpop.xlane.xlu1 %231  ;;  %v3153_v33 = vrot.slane %v3139_v48, %v4663_v32  ;;  %v2840_v30 = vrot.slane %v2832_v49, %v4663_v32  ;;  %v2847_v46 = vrot.slane %v2833_v35, %v4663_v32  ;;  %v4990_v0 = vcombine.low %v1509_v44, %v1516_v45 }
  0xd6   :  { %v4975_v59 = vpop.xlane.xlu0 %183  ;;  %v4992_v2 = vcombine.low %v1523_v52, %v1530_v53  ;;  %v1985_v3 = vrot.slane %v4935_v37, %v4643_v17  ;;  %v1992_v1 = vrot.slane %v4935_v37, %v4646_v18  ;;  %v1999_v13 = vrot.slane %v4935_v37, %v4649_v19 }
  0xd7   :  { %v2006_v8 = vrot.slane %v4935_v37, %v4652_v20  ;;  %v3154_v15 = vcombine.low %v3146_v63, %v3153_v33  ;;  %v2848_v21 = vcombine.low %v2840_v30, %v2847_v46  ;;  %v641_v56 = vrot.slane %v4913_v23, %v4643_v17 }
  0xd8   :  { %v1117_v50 = vrot.slane %v4959_v58, %v4643_v17  ;;  %v1124_v51 = vrot.slane %v4959_v58, %v4646_v18  ;;  %v2611_v5 = vcombine.low %v1089_v38, %v1096_v60  ;;  %v2612_v6 = vcombine.low %v1103_v62, %v1110_v29 }
  0xd9   :  { %v328_v4 = vpop.xlane.xlu1 %327  ;;  %3457 = vperm.xlu0 %4189, %v3154_v15   ;;  %3403 = vperm.xlu1 %4190, %v2848_v21   ;;  %v2313_v24 = vrot.slane %v4877_v47, %v4663_v32  ;;  %v2320_v25 = vrot.slane %v4887_v36, %v4663_v32  ;;  %v5015_v26 = vadd.s32 4294967288, %v4983_v61  ;;  %v648_v27 = vrot.slane %v4913_v23, %v4646_v18 }
  0xda   :  { %v5002_v22 = vpop.xlane.xlu0 %279  ;;  %v655_v28 = vrot.slane %v4913_v23, %v4649_v19  ;;  %v662_v31 = vrot.slane %v4913_v23, %v4652_v20  ;;  %v2619_v34 = vrot.slane %v2611_v5, %v4663_v32  ;;  %v1131_v47 = vrot.slane %v4959_v58, %v4649_v19 }
  0xdb   :  { %v1138_v36 = vrot.slane %v4959_v58, %v4652_v20  ;;  %v2626_v40 = vrot.slane %v2612_v6, %v4663_v32  ;;  %v2321_v16 = vcombine.low %v2313_v24, %v2320_v25  ;;  %v2628_v7 = vcombine.low %v1117_v50, %v1124_v51 }
  0xdc   :  { %v1537_v11 = vrot.slane %v4942_v42, %v4643_v17  ;;  %v1544_v23 = vrot.slane %v4942_v42, %v4646_v18  ;;  %v2013_v9 = vrot.slane %v328_v4, %v4643_v17  ;;  %v2020_v45 = vrot.slane %v328_v4, %v4646_v18 }
  0xdd   :  { %v5024_v37 = vpop.xlane.xlu1 %234  ;;  %v2627_v44 = vcombine.low %v2619_v34, %v2626_v40  ;;  %3310 = vperm.xlu1 %4190, %v2321_v16   ;;  %v2027_v52 = vrot.slane %v328_v4, %v4649_v19  ;;  %v3155_v53 = vcombine.low %v1985_v3, %v1992_v1  ;;  %v2034_v54 = vrot.slane %v328_v4, %v4652_v20 }
  0xde   :  { %v5031_v41 = vpop.xlane.xlu0 %186  ;;  %v3156_v55 = vcombine.low %v1999_v13, %v2006_v8  ;;  %v2857_v57 = vrot.slane %v4906_v14, %v4663_v32  ;;  %v2864_v58 = vrot.slane %v4937_v39, %v4663_v32  ;;  %v5047_v48 = vcombine.low %v641_v56, %v648_v27 }
  0xdf   :  { %v5049_v49 = vcombine.low %v655_v28, %v662_v31  ;;  %v2629_v35 = vcombine.low %v1131_v47, %v1138_v36  ;;  %3364 = vperm.xlu0 %4189, %v2627_v44   ;;  %v3163_v60 = vrot.slane %v3155_v53, %v4663_v32  ;;  %v1551_v63 = vrot.slane %v4942_v42, %v4649_v19 }
  0xe0   :  { %v1558_v14 = vrot.slane %v4942_v42, %v4652_v20  ;;  %v3170_v39 = vrot.slane %v3156_v55, %v4663_v32  ;;  %v2865_v29 = vcombine.low %v2857_v57, %v2864_v58  ;;  %v5059_v33 = vcombine.low %v1537_v11, %v1544_v23 }
  0xe1   :  { %v5045_v38 = vpop.xlane.xlu1 %330  ;;  %v3172_v30 = vcombine.low %v2013_v9, %v2020_v45  ;;  %v669_v46 = vrot.slane %v4975_v59, %v4643_v17  ;;  %v676_v3 = vrot.slane %v4975_v59, %v4646_v18  ;;  %v3173_v1 = vcombine.low %v2027_v52, %v2034_v54 }
  0xe2   :  { %v5052_v62 = vpop.xlane.xlu0 %282  ;;  %v3171_v4 = vcombine.low %v3163_v60, %v3170_v39  ;;  %3406 = vperm.xlu1 %4190, %v2865_v29   ;;  %v1145_v13 = vrot.slane %v5024_v37, %v4643_v17  ;;  %v2636_v42 = vrot.slane %v2628_v7, %v4663_v32  ;;  %v1152_v15 = vrot.slane %v5024_v37, %v4646_v18 }
  0xe3   :  { %v2643_v21 = vrot.slane %v2629_v35, %v4663_v32  ;;  %v2330_v56 = vrot.slane %v4944_v43, %v4663_v32  ;;  %v2337_v50 = vrot.slane %v4949_v12, %v4663_v32  ;;  %v5077_v5 = vcombine.low %v1551_v63, %v1558_v14 }
  0xe4   :  { %v683_v6 = vrot.slane %v4975_v59, %v4649_v19  ;;  %3460 = vperm.xlu0 %4189, %v3171_v4   ;;  %v1159_v24 = vrot.slane %v5024_v37, %v4649_v19  ;;  %v1166_v25 = vrot.slane %v5024_v37, %v4652_v20  ;;  %v690_v43 = vrot.slane %v4975_v59, %v4652_v20 }
  0xe5   :  { %v238_v8 = vpop.xlane.xlu1 %237  ;;  %v5087_v27 = vcombine.low %v669_v46, %v676_v3  ;;  %v2644_v12 = vcombine.low %v2636_v42, %v2643_v21  ;;  %v2338_v28 = vcombine.low %v2330_v56, %v2337_v50  ;;  %v1565_v31 = vrot.slane %v5002_v22, %v4643_v17 }
  0xe6   :  { %v5075_v51 = vpop.xlane.xlu0 %189  ;;  %v1572_v34 = vrot.slane %v5002_v22, %v4646_v18  ;;  %v2041_v47 = vrot.slane %v5045_v38, %v4643_v17  ;;  %v2048_v36 = vrot.slane %v5045_v38, %v4646_v18  ;;  %v2645_v40 = vcombine.low %v1145_v13, %v1152_v15 }
  0xe7   :  { %3313 = vperm.xlu1 %4190, %v2338_v28   ;;  %v3180_v59 = vrot.slane %v3172_v30, %v4663_v32  ;;  %v3187_v16 = vrot.slane %v3173_v1, %v4663_v32  ;;  %v2874_v7 = vrot.slane %v4990_v0, %v4663_v32  ;;  %v2646_v23 = vcombine.low %v1159_v24, %v1166_v25 }
  0xe8   :  { %3367 = vperm.xlu0 %4189, %v2644_v12   ;;  %v2055_v9 = vrot.slane %v5045_v38, %v4649_v19  ;;  %v2062_v44 = vrot.slane %v5045_v38, %v4652_v20  ;;  %v2881_v45 = vrot.slane %v4992_v2, %v4663_v32  ;;  %v5111_v52 = vcombine.low %v683_v6, %v690_v43 }
  0xe9   :  { %v5097_v37 = vpop.xlane.xlu1 %333  ;;  %v1579_v53 = vrot.slane %v5002_v22, %v4649_v19  ;;  %v1586_v0 = vrot.slane %v5002_v22, %v4652_v20  ;;  %v3188_v54 = vcombine.low %v3180_v59, %v3187_v16  ;;  %v5117_v55 = vcombine.low %v1565_v31, %v1572_v34 }
  0xea   :  { %v5103_v11 = vpop.xlane.xlu0 %285  ;;  %v3189_v57 = vcombine.low %v2041_v47, %v2048_v36  ;;  %v2882_v58 = vcombine.low %v2874_v7, %v2881_v45  ;;  %v1173_v35 = vrot.slane %v238_v8, %v4643_v17  ;;  %v1180_v38 = vrot.slane %v238_v8, %v4646_v18 }
  0xeb   :  { %v1187_v2 = vrot.slane %v238_v8, %v4649_v19  ;;  %v1194_v63 = vrot.slane %v238_v8, %v4652_v20  ;;  %v2653_v14 = vrot.slane %v2645_v40, %v4663_v32  ;;  %v3190_v22 = vcombine.low %v2055_v9, %v2062_v44 }
  0xec   :  { %3463 = vperm.xlu0 %4189, %v3188_v54   ;;  %3409 = vperm.xlu1 %4190, %v2882_v58   ;;  %v2660_v29 = vrot.slane %v2646_v23, %v4663_v32  ;;  %v2347_v30 = vrot.slane %v5047_v48, %v4663_v32  ;;  %v5132_v46 = vadd.s32 4294967280, %v4983_v61  ;;  %v5134_v3 = vcombine.low %v1579_v53, %v1586_v0 }
  0xed   :  { %v5120_v60 = vpop.xlane.xlu1 %240  ;;  %v697_v1 = vrot.slane %v5031_v41, %v4643_v17  ;;  %v704_v4 = vrot.slane %v5031_v41, %v4646_v18  ;;  %v2354_v13 = vrot.slane %v5049_v49, %v4663_v32  ;;  %v711_v42 = vrot.slane %v5031_v41, %v4649_v19 }
  0xee   :  { %v5126_v39 = vpop.xlane.xlu0 %192  ;;  %v718_v48 = vrot.slane %v5031_v41, %v4652_v20  ;;  %v1593_v8 = vrot.slane %v5052_v62, %v4643_v17  ;;  %v2661_v15 = vcombine.low %v2653_v14, %v2660_v29  ;;  %v2662_v56 = vcombine.low %v1173_v35, %v1180_v38 }
  0xef   :  { %v2663_v50 = vcombine.low %v1187_v2, %v1194_v63  ;;  %v1600_v6 = vrot.slane %v5052_v62, %v4646_v18  ;;  %v2355_v24 = vcombine.low %v2347_v30, %v2354_v13  ;;  %v2069_v49 = vrot.slane %v5097_v37, %v4643_v17 }
  0xf0   :  { %3370 = vperm.xlu0 %4189, %v2661_v15   ;;  %v2076_v41 = vrot.slane %v5097_v37, %v4646_v18  ;;  %v3197_v43 = vrot.slane %v3189_v57, %v4663_v32  ;;  %v3204_v12 = vrot.slane %v3190_v22, %v4663_v32  ;;  %v2083_v28 = vrot.slane %v5097_v37, %v4649_v19 }
  0xf1   :  { %v5148_v21 = vpop.xlane.xlu1 %336  ;;  %3316 = vperm.xlu1 %4190, %v2355_v24   ;;  %v2090_v31 = vrot.slane %v5097_v37, %v4652_v20  ;;  %v2891_v34 = vrot.slane %v5059_v33, %v4663_v32  ;;  %v2898_v47 = vrot.slane %v5077_v5, %v4663_v32  ;;  %v5168_v36 = vcombine.low %v697_v1, %v704_v4 }
  0xf2   :  { %v5152_v25 = vpop.xlane.xlu0 %288  ;;  %v1607_v40 = vrot.slane %v5052_v62, %v4649_v19  ;;  %v1614_v59 = vrot.slane %v5052_v62, %v4652_v20  ;;  %v3205_v16 = vcombine.low %v3197_v43, %v3204_v12  ;;  %v5176_v23 = vcombine.low %v711_v42, %v718_v48 }
  0xf3   :  { %v5178_v37 = vcombine.low %v1593_v8, %v1600_v6  ;;  %v2899_v9 = vcombine.low %v2891_v34, %v2898_v47  ;;  %v1201_v33 = vrot.slane %v5120_v60, %v4643_v17  ;;  %v1208_v5 = vrot.slane %v5120_v60, %v4646_v18 }
  0xf4   :  { %3466 = vperm.xlu0 %4189, %v3205_v16   ;;  %v1215_v44 = vrot.slane %v5120_v60, %v4649_v19  ;;  %v1222_v62 = vrot.slane %v5120_v60, %v4652_v20  ;;  %v2670_v45 = vrot.slane %v2662_v56, %v4663_v32  ;;  %v3206_v53 = vcombine.low %v2069_v49, %v2076_v41 }
  0xf5   :  { %v5174_v7 = vpop.xlane.xlu1 %243  ;;  %v3207_v0 = vcombine.low %v2083_v28, %v2090_v31  ;;  %3412 = vperm.xlu1 %4190, %v2899_v9   ;;  %v2677_v54 = vrot.slane %v2663_v50, %v4663_v32  ;;  %v2364_v57 = vrot.slane %v5087_v27, %v4663_v32  ;;  %v5194_v35 = vcombine.low %v1607_v40, %v1614_v59 }
  0xf6   :  { %v5192_v58 = vpop.xlane.xlu0 %195  ;;  %v725_v38 = vrot.slane %v5075_v51, %v4643_v17  ;;  %v732_v60 = vrot.slane %v5075_v51, %v4646_v18  ;;  %v2371_v2 = vrot.slane %v5111_v52, %v4663_v32  ;;  %v739_v14 = vrot.slane %v5075_v51, %v4649_v19 }
  0xf7   :  { %v746_v27 = vrot.slane %v5075_v51, %v4652_v20  ;;  %v1621_v22 = vrot.slane %v5103_v11, %v4643_v17  ;;  %v2678_v29 = vcombine.low %v2670_v45, %v2677_v54  ;;  %v2679_v30 = vcombine.low %v1201_v33, %v1208_v5 }
  0xf8   :  { %v2680_v1 = vcombine.low %v1215_v44, %v1222_v62  ;;  %v1628_v4 = vrot.slane %v5103_v11, %v4646_v18  ;;  %v2372_v13 = vcombine.low %v2364_v57, %v2371_v2  ;;  %v2097_v52 = vrot.slane %v5148_v21, %v4643_v17 }
  0xf9   :  { %v5202_v63 = vpop.xlane.xlu1 %339  ;;  %3373 = vperm.xlu0 %4189, %v2678_v29   ;;  %v2104_v42 = vrot.slane %v5148_v21, %v4646_v18  ;;  %v3214_v48 = vrot.slane %v3206_v53, %v4663_v32  ;;  %v3221_v51 = vrot.slane %v3207_v0, %v4663_v32  ;;  %v2111_v8 = vrot.slane %v5148_v21, %v4649_v19 }
  0xfa   :  { %3319 = vperm.xlu1 %4190, %v2372_v13   ;;  %v2118_v15 = vrot.slane %v5148_v21, %v4652_v20  ;;  %v2908_v56 = vrot.slane %v5117_v55, %v4663_v32  ;;  %v2915_v50 = vrot.slane %v5134_v3, %v4663_v32  ;;  %v5226_v6 = vcombine.low %v725_v38, %v732_v60  ;;  %v5232_v43 = vpop.xlane.xlu0 %291 }
  0xfb   :  { %v1635_v24 = vrot.slane %v5103_v11, %v4649_v19  ;;  %v1642_v49 = vrot.slane %v5103_v11, %v4652_v20  ;;  %v3222_v41 = vcombine.low %v3214_v48, %v3221_v51  ;;  %v5234_v12 = vcombine.low %v739_v14, %v746_v27 }
  0xfc   :  { %v5236_v21 = vcombine.low %v1621_v22, %v1628_v4  ;;  %v2916_v28 = vcombine.low %v2908_v56, %v2915_v50  ;;  %v1229_v55 = vrot.slane %v5174_v7, %v4643_v17  ;;  %v1236_v31 = vrot.slane %v5174_v7, %v4646_v18 }
  0xfd   :  { %v5240_v3 = vpop.xlane.xlu1 %246  ;;  %3469 = vperm.xlu0 %4189, %v3222_v41   ;;  %v1243_v11 = vrot.slane %v5174_v7, %v4649_v19  ;;  %v1250_v34 = vrot.slane %v5174_v7, %v4652_v20  ;;  %v2687_v47 = vrot.slane %v2679_v30, %v4663_v32  ;;  %v3223_v40 = vcombine.low %v2097_v52, %v2104_v42 }
  0xfe   :  { %v3224_v59 = vcombine.low %v2111_v8, %v2118_v15  ;;  %3415 = vperm.xlu1 %4190, %v2916_v28   ;;  %v2694_v16 = vrot.slane %v2680_v1, %v4663_v32  ;;  %v2381_v9 = vrot.slane %v5168_v36, %v4663_v32  ;;  %v5252_v33 = vcombine.low %v1635_v24, %v1642_v49  ;;  %v5268_v60 = vpop.xlane.xlu0 %198 }
  0xff   :  { %v753_v5 = vrot.slane %v5126_v39, %v4643_v17  ;;  %v760_v44 = vrot.slane %v5126_v39, %v4646_v18  ;;  %v2388_v7 = vrot.slane %v5176_v23, %v4663_v32  ;;  %v767_v62 = vrot.slane %v5126_v39, %v4649_v19 }
 0x100   :  { %v774_v45 = vrot.slane %v5126_v39, %v4652_v20  ;;  %v1649_v36 = vrot.slane %v5152_v25, %v4643_v17  ;;  %v2695_v53 = vcombine.low %v2687_v47, %v2694_v16  ;;  %v2696_v0 = vcombine.low %v1229_v55, %v1236_v31 }
 0x101   :  { %v2697_v54 = vcombine.low %v1243_v11, %v1250_v34  ;;  %v1656_v57 = vrot.slane %v5152_v25, %v4646_v18  ;;  %v2389_v38 = vcombine.low %v2381_v9, %v2388_v7  ;;  %v2125_v23 = vrot.slane %v5202_v63, %v4643_v17  ;;  %v5276_v27 = vpop.xlane.xlu1 %342 }
 0x102   :  { %3376 = vperm.xlu0 %4189, %v2695_v53   ;;  %v2132_v2 = vrot.slane %v5202_v63, %v4646_v18  ;;  %v3231_v39 = vrot.slane %v3223_v40, %v4663_v32  ;;  %v3238_v14 = vrot.slane %v3224_v59, %v4663_v32  ;;  %v2139_v22 = vrot.slane %v5202_v63, %v4649_v19  ;;  %v5308_v41 = vpop.xlane.xlu0 %294 }
 0x103   :  { %3322 = vperm.xlu1 %4190, %v2389_v38   ;;  %v2146_v29 = vrot.slane %v5202_v63, %v4652_v20  ;;  %v2925_v30 = vrot.slane %v5178_v37, %v4663_v32  ;;  %v2932_v1 = vrot.slane %v5194_v35, %v4663_v32  ;;  %v5286_v4 = vcombine.low %v753_v5, %v760_v44 }
 0x104   :  { %v1663_v13 = vrot.slane %v5152_v25, %v4649_v19  ;;  %v1670_v52 = vrot.slane %v5152_v25, %v4652_v20  ;;  %v3239_v42 = vcombine.low %v3231_v39, %v3238_v14  ;;  %v5292_v48 = vcombine.low %v767_v62, %v774_v45 }
 0x105   :  { %v5294_v51 = vcombine.low %v1649_v36, %v1656_v57  ;;  %v2933_v63 = vcombine.low %v2925_v30, %v2932_v1  ;;  %v1257_v37 = vrot.slane %v5240_v3, %v4643_v17  ;;  %v1264_v35 = vrot.slane %v5240_v3, %v4646_v18  ;;  %v250_v11 = vpop.xlane.xlu1 %249 }
 0x106   :  { %3472 = vperm.xlu0 %4189, %v3239_v42   ;;  %v1271_v8 = vrot.slane %v5240_v3, %v4649_v19  ;;  %v1278_v15 = vrot.slane %v5240_v3, %v4652_v20  ;;  %v2704_v25 = vrot.slane %v2696_v0, %v4663_v32  ;;  %v3240_v56 = vcombine.low %v2125_v23, %v2132_v2  ;;  %v5346_v23 = vpop.xlane.xlu0 %201 }
 0x107   :  { %v3241_v50 = vcombine.low %v2139_v22, %v2146_v29  ;;  %3418 = vperm.xlu1 %4190, %v2933_v63   ;;  %v2711_v24 = vrot.slane %v2697_v54, %v4663_v32  ;;  %v2398_v49 = vrot.slane %v5226_v6, %v4663_v32  ;;  %v5310_v28 = vcombine.low %v1663_v13, %v1670_v52 }
 0x108   :  { %v781_v55 = vrot.slane %v5192_v58, %v4643_v17  ;;  %v788_v3 = vrot.slane %v5192_v58, %v4646_v18  ;;  %v2405_v31 = vrot.slane %v5234_v12, %v4663_v32  ;;  %v795_v34 = vrot.slane %v5192_v58, %v4649_v19 }
 0x109   :  { %v802_v6 = vrot.slane %v5192_v58, %v4652_v20  ;;  %v1677_v47 = vrot.slane %v5232_v43, %v4643_v17  ;;  %v2712_v40 = vcombine.low %v2704_v25, %v2711_v24  ;;  %v2713_v59 = vcombine.low %v1257_v37, %v1264_v35 }
 0x10a   :  { %v2714_v16 = vcombine.low %v1271_v8, %v1278_v15  ;;  %v1684_v9 = vrot.slane %v5232_v43, %v4646_v18  ;;  %v2406_v5 = vcombine.low %v2398_v49, %v2405_v31  ;;  %v2153_v12 = vrot.slane %v5276_v27, %v4643_v17 }
 0x10b   :  { %3379 = vperm.xlu0 %4189, %v2712_v40   ;;  %v2160_v44 = vrot.slane %v5276_v27, %v4646_v18  ;;  %v3248_v7 = vrot.slane %v3240_v56, %v4663_v32  ;;  %v3255_v58 = vrot.slane %v3241_v50, %v4663_v32  ;;  %v2167_v62 = vrot.slane %v5276_v27, %v4649_v19 }
 0x10c   :  { %3325 = vperm.xlu1 %4190, %v2406_v5   ;;  %v2174_v45 = vrot.slane %v5276_v27, %v4652_v20  ;;  %v2942_v36 = vrot.slane %v5236_v21, %v4663_v32  ;;  %v2949_v53 = vrot.slane %v5252_v33, %v4663_v32  ;;  %v5340_v0 = vcombine.low %v781_v55, %v788_v3  ;;  %v346_v27 = vpop.xlane.xlu1 %345  ;;  %v5368_v55 = vpop.xlane.xlu0 %297 }
 0x10d   :  { %v1691_v54 = vrot.slane %v5232_v43, %v4649_v19  ;;  %v1698_v57 = vrot.slane %v5232_v43, %v4652_v20  ;;  %v3256_v38 = vcombine.low %v3248_v7, %v3255_v58  ;;  %v2425_v2 = vcombine.low %v795_v34, %v802_v6 }
 0x10e   :  { %v5348_v39 = vcombine.low %v1677_v47, %v1684_v9  ;;  %v2950_v14 = vcombine.low %v2942_v36, %v2949_v53  ;;  %v1285_v21 = vrot.slane %v250_v11, %v4643_v17  ;;  %v1292_v33 = vrot.slane %v250_v11, %v4646_v18 }
 0x10f   :  { %3475 = vperm.xlu0 %4189, %v3256_v38   ;;  %v1299_v22 = vrot.slane %v250_v11, %v4649_v19  ;;  %v1306_v29 = vrot.slane %v250_v11, %v4652_v20  ;;  %v2721_v30 = vrot.slane %v2713_v59, %v4663_v32  ;;  %v3257_v43 = vcombine.low %v2153_v12, %v2160_v44 }
 0x110   :  { %v3258_v1 = vcombine.low %v2167_v62, %v2174_v45  ;;  %3421 = vperm.xlu1 %4190, %v2950_v14   ;;  %v2728_v13 = vrot.slane %v2714_v16, %v4663_v32  ;;  %v2415_v52 = vrot.slane %v5286_v4, %v4663_v32  ;;  %v2969_v42 = vcombine.low %v1691_v54, %v1698_v57 }
 0x111   :  { %v2422_v63 = vrot.slane %v5292_v48, %v4663_v32  ;;  %v2181_v37 = vrot.slane %v346_v27, %v4643_v17  ;;  %v2188_v35 = vrot.slane %v346_v27, %v4646_v18  ;;  %v809_v8 = vrot.slane %v5268_v60, %v4643_v17 }
 0x112   :  { %v2729_v15 = vcombine.low %v2721_v30, %v2728_v13  ;;  %v2195_v25 = vrot.slane %v346_v27, %v4649_v19  ;;  %v2202_v56 = vrot.slane %v346_v27, %v4652_v20  ;;  %v816_v50 = vrot.slane %v5268_v60, %v4646_v18 }
 0x113   :  { %v2730_v4 = vcombine.low %v1285_v21, %v1292_v33  ;;  %v2731_v24 = vcombine.low %v1299_v22, %v1306_v29  ;;  %v2423_v49 = vcombine.low %v2415_v52, %v2422_v63  ;;  %v823_v48 = vrot.slane %v5268_v60, %v4649_v19 }
 0x114   :  { %v830_v3 = vrot.slane %v5268_v60, %v4652_v20  ;;  %3382 = vperm.xlu0 %4189, %v2729_v15   ;;  %v3265_v31 = vrot.slane %v3257_v43, %v4663_v32  ;;  %v3272_v11 = vrot.slane %v3258_v1, %v4663_v32  ;;  %v3274_v34 = vcombine.low %v2181_v37, %v2188_v35 }
 0x115   :  { %3328 = vperm.xlu1 %4190, %v2423_v49   ;;  %v3275_v6 = vcombine.low %v2195_v25, %v2202_v56  ;;  %v2959_v47 = vrot.slane %v5294_v51, %v4663_v32  ;;  %v2966_v40 = vrot.slane %v5310_v28, %v4663_v32  ;;  %v1705_v16 = vrot.slane %v5308_v41, %v4643_v17 }
 0x116   :  { %v3296_v59 = vpop.permute.xlu1 %3295  ;;  %v1712_v60 = vrot.slane %v5308_v41, %v4646_v18  ;;  %v1719_v9 = vrot.slane %v5308_v41, %v4649_v19  ;;  %v3273_v5 = vcombine.low %v3265_v31, %v3272_v11  ;;  %v1726_v12 = vrot.slane %v5308_v41, %v4652_v20  ;;  %v3293_v41 = vpop.permute.xlu0 %3292 }
 0x117   :  { %v2967_v44 = vcombine.low %v2959_v47, %v2966_v40  ;;  %v2738_v51 = vrot.slane %v2730_v4, %v4663_v32  ;;  %v2745_v7 = vrot.slane %v2731_v24, %v4663_v32  ;;  %v2441_v28 = vcombine.low %v809_v8, %v816_v50 }
 0x118   :  { %3478 = vperm.xlu0 %4189, %v3273_v5   ;;  %v2432_v58 = vrot.slane %v5340_v0, %v4663_v32  ;;  %v2439_v62 = vrot.slane %v2425_v2, %v4663_v32  ;;  %v5395_v45 = vsub.s32 %v4983_v61, %v4640_v10  ;;  %v2442_v36 = vcombine.low %v823_v48, %v830_v3  ;;  %v4191_v5 = vld [vmem:[%s5773_s1 + $0x78] sm:$0xff]  }
 0x119   :  { %3424 = vperm.xlu1 %4190, %v2967_v44   ;;  %v2746_v53 = vcombine.low %v2738_v51, %v2745_v7  ;;  %v3282_v54 = vrot.slane %v3274_v34, %v4663_v32  ;;  %v3289_v57 = vrot.slane %v3275_v6, %v4663_v32  ;;  %v2985_v14 = vcombine.low %v1705_v16, %v1712_v60  ;;  %v4192_v44 = vld [vmem:[%s5773_s1 + $0x38] sm:$0xff]  }
 0x11a   :  { %v3341_v38 = vpop.permute.xlu1 %3340  ;;  %v2440_v21 = vcombine.low %v2432_v58, %v2439_v62  ;;  %v2976_v0 = vrot.slane %v5348_v39, %v4663_v32  ;;  %v2983_v2 = vrot.slane %v2969_v42, %v4663_v32  ;;  %v2986_v27 = vcombine.low %v1719_v9, %v1726_v12  ;;  %4160 = vmatprep.subr.bf16.mxu0 %v4191_v5 }
 0x11b   :  { %v837_v33 = vrot.slane %v5346_v23, %v4643_v17  ;;  %v844_v22 = vrot.slane %v5346_v23, %v4646_v18  ;;  %v5408_v29 = vsub.s32 %v5015_v26, %v4640_v10  ;;  %v851_v30 = vrot.slane %v5346_v23, %v4649_v19  ;;  %4161 = vmatpush3.bf16.msra.mxu0 %v4192_v44 }
 0x11c   :  { %v858_v43 = vrot.slane %v5346_v23, %v4652_v20  ;;  %3385 = vperm.xlu0 %4189, %v2746_v53   ;;  %v3488_v39 = vrot.slane %v3293_v41, %v5395_v45  ;;  %v3290_v1 = vcombine.low %v3282_v54, %v3289_v57  ;;  %v2984_v13 = vcombine.low %v2976_v0, %v2983_v2  ;;  %v4193_v41 = vld [vmem:[%s5773_s1 + $0x70] sm:$0xff]  }
 0x11d   :  { %3331 = vperm.xlu1 %4190, %v2440_v21   ;;  %v3493_v52 = vrot.slane %v3296_v59, %v5408_v29  ;;  %v2449_v42 = vrot.slane %v2441_v28, %v4663_v32  ;;  %v2456_v63 = vrot.slane %v2442_v36, %v4663_v32  ;;  %v3597_v37 = vrot.slane %v3341_v38, %v5395_v45  ;;  %v4194_v54 = vld [vmem:[%s5773_s1 + $0x30] sm:$0xff]  }
 0x11e   :  { %v3344_v26 = vpop.permute.xlu1 %3343  ;;  %v5422_v23 = vsub.s32 %v5132_v46, %v4640_v10  ;;  %v2458_v8 = vcombine.low %v837_v33, %v844_v22  ;;  %v1733_v15 = vrot.slane %v5368_v55, %v4643_v17  ;;  %v2459_v56 = vcombine.low %v851_v30, %v858_v43  ;;  %4162 = vmatprep.subr.bf16.mxu0 %v4193_v41  ;;  %v4195_v30 = vld [vmem:[%s5773_s1 + $0x68] sm:$0xff]  }
 0x11f   :  { %v3601_v35 = vrot.slane %v3344_v26, %v5408_v29  ;;  %v5427_v25 = vsel %vm3494_vm0, %v3493_v52, %v3488_v39  ;;  %v1740_v50 = vrot.slane %v5368_v55, %v4646_v18  ;;  %v1747_v4 = vrot.slane %v5368_v55, %v4649_v19  ;;  %4163 = vmatpush3.bf16.msra.mxu0 %v4194_v54  ;;  %v4196_v43 = vld [vmem:[%s5773_s1 + $0x28] sm:$0xff]  }
 0x120   :  { %3481 = vperm.xlu0 %4189, %v3290_v1   ;;  %v1754_v46 = vrot.slane %v5368_v55, %v4652_v20  ;;  %v2457_v49 = vcombine.low %v2449_v42, %v2456_v63  ;;  %v2993_v17 = vrot.slane %v2985_v14, %v4663_v32  ;;  %v3000_v48 = vrot.slane %v2986_v27, %v4663_v32 }
 0x121   :  { %v3602_v24 = vsel %vm3494_vm0, %v3601_v35, %v3597_v37  ;;  %3427 = vperm.xlu1 %4190, %v2984_v13   ;;  %v3503_v18 = vadd.s32 4294967272, %v4983_v61  ;;  %v3002_v34 = vcombine.low %v1733_v15, %v1740_v50  ;;  %v2466_v20 = vrot.slane %v2458_v8, %v4663_v32  ;;  %4164 = vmatprep.subr.bf16.mxu0 %v4195_v30  ;;  %v4197_v37 = vld [vmem:[%s5773_s1 + $0x60] sm:$0xff]  }
 0x122   :  { %v3389_v3 = vpop.permute.xlu1 %3388  ;;  %v3347_v31 = vpop.permute.xlu0 %3346  ;;  %v3003_v6 = vcombine.low %v1747_v4, %v1754_v46  ;;  %v3001_v47 = vcombine.low %v2993_v17, %v3000_v48  ;;  %v2473_v55 = vrot.slane %v2459_v56, %v4663_v32  ;;  %v3510_v53 = vadd.s32 4294967264, %v4983_v61  ;;  %v4198_v35 = vld [vmem:[%s5773_s1 + $0x20] sm:$0xff]  }
 0x123   :  { %v3606_v11 = vrot.slane %v3347_v31, %v5422_v23  ;;  %v3676_v16 = vrot.slane %v3389_v3, %v5395_v45  ;;  %v5446_v9 = vsub.s32 %v3503_v18, %v4640_v10  ;;  %v3010_v7 = vrot.slane %v3002_v34, %v4663_v32  ;;  %4165 = vmatpush3.bf16.msra.mxu0 %v4196_v43  ;;  %v4202_v18 = vld [vmem:[%s5773_s1 + $0x10] sm:$0xff]  }
 0x124   :  { %v2474_v51 = vcombine.low %v2466_v20, %v2473_v55  ;;  %v3017_v28 = vrot.slane %v3003_v6, %v4663_v32  ;;  %v4224_v38 = vmov 0.0   ;;  %v5470_v22 = vsub.s32 %v3510_v53, %v4640_v10  ;;  %4166 = vmatprep.subr.bf16.mxu0 %v4197_v37  ;;  %v4204_v55 = vld [vmem:[%s5773_s1 + $0x8] sm:$0xff]  }
 0x125   :  { %v3607_v19 = vsel %vm3501_vm1, %v3606_v11, %v3602_v24  ;;  %3334 = vperm.xlu1 %4190, %v2457_v49   ;;  %25 = vst [vmem:[#allocation2] sm:$0xf] %v4224_v38  ;;  %v3517_v26 = vadd.s32 4294967256, %v4983_v61  ;;  %v4199_v24 = vld [vmem:[%s5773_s1 + $0x58] sm:$0xff]  }
 0x126   :  { %v3392_v40 = vpop.permute.xlu1 %3391  ;;  %v3443_v59 = vpop.permute.xlu0 %3442  ;;  %v3018_v14 = vcombine.low %v3010_v7, %v3017_v28  ;;  %v4200_v49 = vld [vmem:[%s5773_s1 + $0x18] sm:$0xff]  }
 0x127   :  { %v3680_v60 = vrot.slane %v3392_v40, %v5408_v29  ;;  %v3764_v21 = vrot.slane %v3443_v59, %v5422_v23  ;;  %v3520_v4 = vsub.s32 %v3517_v26, %v4640_v10  ;;  %4167 = vmatpush3.bf16.msra.mxu0 %v4198_v35  ;;  %v4205_v59 = vld [vmem:[%s5773_s1 + $0x40] sm:$0xff]  }
 0x128   :  { %4168 = vmatprep.subr.bf16.mxu0 %v4199_v24 }
 0x129   :  { %v3681_v12 = vsel %vm3494_vm0, %v3680_v60, %v3676_v16  ;;  %3430 = vperm.xlu1 %4190, %v3001_v47   ;;  %v3524_v47 = vadd.s32 4294967248, %v4983_v61 }
 0x12a   :  { %v3437_v58 = vpop.permute.xlu1 %3436  ;;  %v3350_v62 = vpop.permute.xlu0 %3349 }
 0x12b   :  { %v3611_v36 = vrot.slane %v3350_v62, %v5446_v9  ;;  %v3755_v27 = vrot.slane %v3437_v58, %v5395_v45  ;;  %4169 = vmatpush3.bf16.msra.mxu0 %v4200_v49 }
 0x12d   :  { %v3612_v57 = vsel %vm3508_vm2, %v3611_v36, %v3607_v19  ;;  %3337 = vperm.xlu1 %4190, %v2474_v51   ;;  %v4203_v19 = vld [vmem:[%s5773_s1 + $0x48] sm:$0xff]   ;;  %v4206_v51 = vld [vmem:[%s5773_s1] sm:$0xff]  }
 0x12e   :  { %v3440_v0 = vpop.permute.xlu1 %3439  ;;  %v3446_v2 = vpop.permute.xlu0 %3445 }
 0x12f   :  { %v3759_v33 = vrot.slane %v3440_v0, %v5408_v29  ;;  %v3769_v1 = vrot.slane %v3446_v2, %v5446_v9 }
 0x131   :  { %v3760_v39 = vsel %vm3494_vm0, %v3759_v33, %v3755_v27  ;;  %3433 = vperm.xlu1 %4190, %v3018_v14   ;;  %vm4064_vm0 = vcmask 130048  }
 0x132   :  { %v3765_v45 = vsel %vm3501_vm1, %v3764_v21, %v3760_v39  ;;  %v3299_v29 = vpop.permute.xlu1 %3298  ;;  %v3353_v13 = vpop.permute.xlu0 %3352 }
 0x133   :  { %v3770_v52 = vsel %vm3508_vm2, %v3769_v1, %v3765_v45  ;;  %v3500_v42 = vrot.slane %v3299_v29, %v5422_v23  ;;  %v3616_v63 = vrot.slane %v3353_v13, %v5470_v22 }
 0x135   :  { %v3502_v8 = vsel %vm3501_vm1, %v3500_v42, %v5427_v25  ;;  %v3617_v15 = vsel %vm3515_vm3, %v3616_v63, %v3612_v57  ;;  %v4201_v25 = vld [vmem:[%s5773_s1 + $0x50] sm:$0xff]  }
 0x136   :  { %v3449_v56 = vpop.permute.xlu0 %3448  ;;  %v3395_v46 = vpop.permute.xlu1 %3394  ;;  %4170 = vmatprep.subr.bf16.mxu0 %v4201_v25 }
 0x137   :  { %v3774_v50 = vrot.slane %v3449_v56, %v5470_v22  ;;  %v3685_v17 = vrot.slane %v3395_v46, %v5422_v23  ;;  %4171 = vmatpush3.bf16.msra.mxu0 %v4202_v18  ;;  %v3538_v18 = vadd.s32 4294967232, %v4983_v61 }
 0x138   :  { %4172 = vmatprep.subr.bf16.mxu0 %v4203_v19  ;;  %v3545_v19 = vadd.s32 4294967224, %v4983_v61 }
 0x139   :  { %v3775_v48 = vsel %vm3515_vm3, %v3774_v50, %v3770_v52  ;;  %v3686_v31 = vsel %vm3501_vm1, %v3685_v17, %v3681_v12  ;;  %v5526_v12 = vsub.s32 %v3524_v47, %v4640_v10  ;;  %v3559_v47 = vadd.s32 4294967208, %v4983_v61 }
 0x13a   :  { %v3356_v3 = vpop.permute.xlu0 %3355 }
 0x13b   :  { %v3621_v11 = vrot.slane %v3356_v3, %v3520_v4  ;;  %v3302_v34 = vpop.permute.xlu1 %3301  ;;  %4173 = vmatpush3.bf16.msra.mxu0 %v4204_v55  ;;  %v3566_v55 = vadd.s32 4294967200, %v4983_v61 }
 0x13c   :  { %v3507_v23 = vrot.slane %v3302_v34, %v5446_v9  ;;  %4174 = vmatprep.subr.bf16.mxu0 %v4205_v59  ;;  %v5616_v59 = vsub.s32 %v3545_v19, %v4640_v10 }
 0x13d   :  { %v3622_v6 = vsel %vm3522_vm4, %v3621_v11, %v3617_v15 }
 0x13e   :  { %v3509_v20 = vsel %vm3508_vm2, %v3507_v23, %v3502_v8  ;;  %v3552_v23 = vadd.s32 4294967216, %v4983_v61 }
 0x13f   :  { %v3452_v40 = vpop.permute.xlu0 %3451  ;;  %4175 = vmatpush3.bf16.msra.mxu0 %v4206_v51 }
 0x140   :  { %v3398_v16 = vpop.permute.xlu1 %3397  ;;  %v3779_v60 = vrot.slane %v3452_v40, %v3520_v4 }
 0x141   :  { %v3690_v5 = vrot.slane %v3398_v16, %v5446_v9  ;;  %v3573_v16 = vadd.s32 4294967192, %v4983_v61 }
 0x142   :  { %v5529_v44 = vsel %vm3522_vm4, %v3779_v60, %v3775_v48 }
 0x143   :  { %v3691_v7 = vsel %vm3508_vm2, %v3690_v5, %v3686_v31  ;;  %v3531_v31 = vadd.s32 4294967240, %v4983_v61  ;;  %v3580_v5 = vadd.s32 4294967184, %v4983_v61 }
 0x144   :  { %v3359_v28 = vpop.permute.xlu0 %3358 }
 0x145   :  { %v3626_v58 = vrot.slane %v3359_v28, %v5526_v12  ;;  %v3587_v28 = vadd.s32 4294967176, %v4983_v61 }
 0x146   :  { %v3305_v62 = vpop.permute.xlu1 %3304 }
 0x147   :  { %v3514_v9 = vrot.slane %v3305_v62, %v5470_v22  ;;  %v5538_v36 = vsel %vm3529_vm5, %v3626_v58, %v3622_v6  ;;  %v5608_v6 = vsub.s32 %v3531_v31, %v4640_v10 }
 0x149   :  { %v3516_v53 = vsel %vm3515_vm3, %v3514_v9, %v3509_v20  ;;  %v5612_v20 = vsub.s32 %v3538_v18, %v4640_v10  ;;  %v5633_v9 = vsub.s32 %v3559_v47, %v4640_v10 }
 0x14a   :  { %v5541_v41 = vpop.permute.xlu0 %3454 }
 0x14b   :  { %v3401_v54 = vpop.permute.xlu1 %3400  ;;  %v3784_v51 = vrot.slane %v5541_v41, %v5526_v12 }
 0x14c   :  { %v3695_v57 = vrot.slane %v3401_v54, %v5470_v22  ;;  %v5640_v54 = vsub.s32 %v3566_v55, %v4640_v10 }
 0x14e   :  { %v3696_v38 = vsel %vm3515_vm3, %v3695_v57, %v3691_v7  ;;  %v5625_v7 = vsub.s32 %v3552_v23, %v4640_v10 }
 0x14f   :  { %v3308_v14 = vpop.permute.xlu1 %3307  ;;  %v5545_v21 = vpop.permute.xlu0 %3361 }
 0x150   :  { %v3521_v0 = vrot.slane %v3308_v14, %v3520_v4  ;;  %v3631_v58 = vrot.slane %v5545_v21, %v5608_v6  ;;  %v5647_v14 = vsub.s32 %v3573_v16, %v4640_v10  ;;  %v5650_v21 = vsub.s32 %v3580_v5, %v4640_v10 }
 0x152   :  { %v3523_v2 = vsel %vm3522_vm4, %v3521_v0, %v3516_v53 }
 0x154   :  { %v3404_v27 = vpop.permute.xlu1 %3403  ;;  %v5548_v33 = vpop.permute.xlu0 %3457 }
 0x155   :  { %v3700_v30 = vrot.slane %v3404_v27, %v3520_v4  ;;  %v3789_v62 = vrot.slane %v5548_v33, %v5608_v6 }
 0x157   :  { %v5551_v43 = vsel %vm3522_vm4, %v3700_v30, %v3696_v38  ;;  %v5661_v30 = vsub.s32 %v3587_v28, %v4640_v10 }
 0x158   :  { %v3311_v39 = vpop.permute.xlu1 %3310 }
 0x159   :  { %v3528_v1 = vrot.slane %v3311_v39, %v5526_v12  ;;  %v3632_v39 = vsel %vm3536_vm6, %v3631_v58, %v5538_v36 }
 0x15a   :  { %v5554_v45 = vpop.permute.xlu0 %3364 }
 0x15b   :  { %v5557_v22 = vsel %vm3529_vm5, %v3528_v1, %v3523_v2  ;;  %v3636_v53 = vrot.slane %v5554_v45, %v5612_v20  ;;  %v3785_v2 = vsel %vm3529_vm5, %v3784_v51, %v5529_v44 }
 0x15c   :  { %v3790_v1 = vsel %vm3536_vm6, %v3789_v62, %v3785_v2 }
 0x15d   :  { %v5559_v29 = vpop.permute.xlu1 %3406 }
 0x15e   :  { %v3705_v2 = vrot.slane %v5559_v29, %v5526_v12 }
 0x15f   :  { %v5561_v13 = vpop.permute.xlu0 %3460 }
 0x160   :  { %v3794_v41 = vrot.slane %v5561_v13, %v5612_v20  ;;  %v3637_v13 = vsel %vm3543_vm7, %v3636_v53, %v3632_v39  ;;  %v3706_v12 = vsel %vm3529_vm5, %v3705_v2, %v5551_v43  ;;  %v4046_v2 = vsub.s32 0, %v4640_v10 }
 0x162   :  { %v5563_v52 = vpop.permute.xlu1 %3313 }
 0x163   :  { %v5565_v42 = vpop.permute.xlu0 %3367 }
 0x164   :  { %v3641_v57 = vrot.slane %v5565_v42, %v5616_v59  ;;  %v3795_v42 = vsel %vm3543_vm7, %v3794_v41, %v3790_v1 }
 0x166   :  { %v3642_v36 = vsel %vm3550_vm8, %v3641_v57, %v3637_v13 }
 0x167   :  { %v5567_v63 = vpop.permute.xlu1 %3409  ;;  %v5569_v26 = vpop.permute.xlu0 %3463 }
 0x168   :  { %v3799_v38 = vrot.slane %v5569_v26, %v5616_v59 }
 0x16a   :  { %v3800_v31 = vsel %vm3550_vm8, %v3799_v38, %v3795_v42 }
 0x16b   :  { %v5571_v37 = vpop.permute.xlu0 %3370 }
 0x16c   :  { %v5573_v35 = vpop.permute.xlu1 %3316  ;;  %v3646_v27 = vrot.slane %v5571_v37, %v5625_v7 }
 0x16d   :  { %v3542_v39 = vrot.slane %v5573_v35, %v5612_v20 }
 0x16e   :  { %v3647_v19 = vsel %vm3557_vm9, %v3646_v27, %v3642_v36  ;;  %v3535_v27 = vrot.slane %v5563_v52, %v5608_v6 }
 0x16f   :  { %v5575_v8 = vpop.permute.xlu0 %3466 }
 0x170   :  { %v5577_v15 = vpop.permute.xlu1 %3412  ;;  %v3804_v33 = vrot.slane %v5575_v8, %v5625_v7 }
 0x171   :  { %v3715_v1 = vrot.slane %v5577_v15, %v5612_v20 }
 0x172   :  { %v3805_v23 = vsel %vm3557_vm9, %v3804_v33, %v3800_v31  ;;  %v3710_v33 = vrot.slane %v5567_v63, %v5608_v6  ;;  %v3537_v63 = vsel %vm3536_vm6, %v3535_v27, %v5557_v22  ;;  %v4042_v27 = vld [vmem:[%s5776_s4] sm:$0x3] }
 0x174   :  { %v5579_v56 = vpop.permute.xlu0 %3373  ;;  %v3711_v35 = vsel %vm3536_vm6, %v3710_v33, %v3706_v12  ;;  %v4050_v33 = vsub.s32 1, %v4640_v10 }
 0x175   :  { %v5581_v50 = vpop.permute.xlu1 %3319  ;;  %v3651_v45 = vrot.slane %v5579_v56, %v5633_v9  ;;  %v3716_v43 = vsel %vm3543_vm7, %v3715_v1, %v3711_v35 }
 0x176   :  { %v4051_v1 = vrot.slane %v4042_v27, %v4050_v33 }
 0x177   :  { %v3652_v47 = vsel %vm3564_vm10, %v3651_v45, %v3647_v19 }
 0x178   :  { %v5583_v4 = vpop.permute.xlu0 %3469 }
 0x179   :  { %v5585_v24 = vpop.permute.xlu1 %3415  ;;  %v3809_v44 = vrot.slane %v5583_v4, %v5633_v9 }
 0x17a   :  { %v3720_v13 = vrot.slane %v5585_v24, %v5616_v59  ;;  %v3544_v24 = vsel %vm3543_vm7, %v3542_v39, %v3537_v63  ;;  %v4047_v39 = vrot.slane %v4042_v27, %v4046_v2 }
 0x17b   :  { %v3810_v55 = vsel %vm3564_vm10, %v3809_v44, %v3805_v23  ;;  %v3549_v44 = vrot.slane %v5581_v50, %v5616_v59 }
 0x17c   :  { %v3721_v20 = vsel %vm3550_vm8, %v3720_v13, %v3716_v43 }
 0x17d   :  { %v5587_v46 = vpop.permute.xlu0 %3376  ;;  %v3551_v22 = vsel %vm3550_vm8, %v3549_v44, %v3544_v24 }
 0x17e   :  { %v5589_v49 = vpop.permute.xlu1 %3322  ;;  %v3656_v26 = vrot.slane %v5587_v46, %v5640_v54 }
 0x17f   :  { %v3556_v29 = vrot.slane %v5589_v49, %v5625_v7 }
 0x181   :  { %v5591_v25 = vpop.permute.xlu0 %3472 }
 0x182   :  { %v5593_v17 = vpop.permute.xlu1 %3418  ;;  %v3814_v37 = vrot.slane %v5591_v25, %v5640_v54 }
 0x183   :  { %v3725_v52 = vrot.slane %v5593_v17, %v5625_v7 }
 0x185   :  { %v3726_v7 = vsel %vm3557_vm9, %v3725_v52, %v3721_v20 }
 0x186   :  { %v5595_v48 = vpop.permute.xlu0 %3379 }
 0x187   :  { %v5597_v3 = vpop.permute.xlu1 %3325  ;;  %v3661_v56 = vrot.slane %v5595_v48, %v5647_v14  ;;  %v3657_v48 = vsel %vm3571_vm11, %v3656_v26, %v3652_v47 }
 0x188   :  { %v3563_v15 = vrot.slane %v5597_v3, %v5633_v9 }
 0x189   :  { %v3662_v51 = vsel %vm3578_vm12, %v3661_v56, %v3657_v48 }
 0x18a   :  { %v5600_v11 = vpop.permute.xlu0 %3475 }
 0x18b   :  { %v5603_v34 = vpop.permute.xlu1 %3421  ;;  %v3819_v4 = vrot.slane %v5600_v11, %v5647_v14  ;;  %v3815_v11 = vsel %vm3571_vm11, %v3814_v37, %v3810_v55 }
 0x18c   :  { %v3730_v50 = vrot.slane %v5603_v34, %v5633_v9  ;;  %v3558_v34 = vsel %vm3557_vm9, %v3556_v29, %v3551_v22 }
 0x18d   :  { %v3820_v28 = vsel %vm3578_vm12, %v3819_v4, %v3815_v11  ;;  %v3565_v42 = vsel %vm3564_vm10, %v3563_v15, %v3558_v34 }
 0x18f   :  { %v3383_v40 = vpop.permute.xlu0 %3382 }
 0x190   :  { %v5619_v60 = vpop.permute.xlu1 %3328  ;;  %v3666_v46 = vrot.slane %v3383_v40, %v5650_v21 }
 0x191   :  { %v3570_v49 = vrot.slane %v5619_v60, %v5640_v54 }
 0x192   :  { %v3667_v62 = vsel %vm3585_vm13, %v3666_v46, %v3662_v51  ;;  %v26_v46 = vld [vmem:[#allocation2] sm:$0xf]  ;;  %v4207_v51 = vld [vmem:[%s5774_s3 + $0x4] ss:$8 sps:$4 sm:$0xff]  }
 0x193   :  { %v3479_v61 = vpop.permute.xlu0 %3478  ;;  %v3572_v26 = vsel %vm3571_vm11, %v3570_v49, %v3565_v42  ;;  %4082 = vmatprep.subr.bf16.mxu1 %v4207_v51 }
 0x194   :  { %v5652_v0 = vpop.permute.xlu1 %3424  ;;  %v3824_v25 = vrot.slane %v3479_v61, %v5650_v21 }
 0x195   :  { %v3735_v17 = vrot.slane %v5652_v0, %v5640_v54  ;;  %v3731_v54 = vsel %vm3564_vm10, %v3730_v50, %v3726_v7 }
 0x196   :  { %v3825_v53 = vsel %vm3585_vm13, %v3824_v25, %v3820_v28  ;;  %v4209_v28 = vld [vmem:[%s5774_s3] ss:$8 sps:$4 sm:$0xff]  }
 0x197   :  { %v3386_v8 = vpop.permute.xlu0 %3385  ;;  %v3736_v37 = vsel %vm3571_vm11, %v3735_v17, %v3731_v54  ;;  %4083 = vmatpush1.bf16.msra.mxu1 %v4209_v28 }
 0x198   :  { %v3332_v18 = vpop.permute.xlu1 %3331  ;;  %v3671_v16 = vrot.slane %v3386_v8, %v5661_v30 }
 0x199   :  { %v3577_v3 = vrot.slane %v3332_v18, %v5647_v14 }
 0x19a   :  { %v3672_v41 = vsel %vm3592_vm14, %v3671_v16, %v3667_v62 }
 0x19b   :  { %v3482_v5 = vpop.permute.xlu0 %3481 }
 0x19c   :  { %v3428_v40 = vpop.permute.xlu1 %3427  ;;  %v3829_v58 = vrot.slane %v3482_v5, %v5661_v30 }
 0x19d   :  { %v3740_v59 = vrot.slane %v3428_v40, %v5647_v14  ;;  %v3579_v14 = vsel %vm3578_vm12, %v3577_v3, %v3572_v26 }
 0x19e   :  { %v3830_v61 = vsel %vm3592_vm14, %v3829_v58, %v3825_v53 }
 0x19f   :  { %v3833_v57 = vsel %vm3831_vm15, %v3830_v61, %v3672_v41  ;;  %v3741_v36 = vsel %vm3578_vm12, %v3740_v59, %v3736_v37 }
 0x1a0   :  { %v3335_v38 = vpop.permute.xlu1 %3334 }
 0x1a1   :  { %v3584_v9 = vrot.slane %v3335_v38, %v5650_v21 }
 0x1a3   :  { %v3586_v56 = vsel %vm3585_vm13, %v3584_v9, %v3579_v14 }
 0x1a4   :  { %v3431_v45 = vpop.permute.xlu1 %3430 }
 0x1a5   :  { %v3745_v60 = vrot.slane %v3431_v45, %v5650_v21 }
 0x1a7   :  { %v3746_v21 = vsel %vm3585_vm13, %v3745_v60, %v3741_v36 }
 0x1a8   :  { %v3338_v6 = vpop.permute.xlu1 %3337 }
 0x1a9   :  { %v3591_v0 = vrot.slane %v3338_v6, %v5661_v30 }
 0x1ab   :  { %v3593_v4 = vsel %vm3592_vm14, %v3591_v0, %v3586_v56 }
 0x1ac   :  { %v3434_v8 = vpop.permute.xlu1 %3433 }
 0x1ad   :  { %v3750_v31 = vrot.slane %v3434_v8, %v5661_v30 }
 0x1af   :  { %v3751_v18 = vsel %vm3592_vm14, %v3750_v31, %v3746_v21 }
 0x1b0   :  { %v3832_v19 = vsel %vm3831_vm15, %v3751_v18, %v3593_v4 }
 0x1b1   :  { %v3834_v23 = vcombine.low %v3832_v19, %v3833_v57 }
 0x1b3   :  { %v3841_v25 = vrot.slane %v3834_v23, %v4663_v32 }
 0x1b5   :  { %v3843_v47 = vadd.f32 %v3841_v25, %v26_v46 }
 0x1b7   :  { %3844 = vst [vmem:[#allocation2] sm:$0xf] %v3843_v47 }
 0x1be   :  { %v3848_v55 = vld [vmem:[#allocation2] sm:$0xf] }
 0x1bf   :  { %v3849_v16 = vmul.f32 0.00390625, %v3848_v55 }
 0x1c1   :  { %v3857_v30 = vrot.slane %v3849_v16, %v4663_v32  ;;  %v4137_v32 = vld [vmem:[%s5775_s2] ss:$0 sm:$0xff] }
 0x1c3   :  { %v3858_v48 = vcombine.high %v3857_v30, %v3857_v30  ;;  %v3861_v5 = vpack.c.bf16 %v3857_v30, %v3857_v30 }
 0x1c5   :  { %v3862_v11 = vpack.c.bf16 %v3858_v48, %v3858_v48 }
 0x1c7   :  { %4030 = vmatprep.mubr.bf16.mxu0 %v3862_v11 }
 0x1c8   :  { %4031 = vmatmul.mubr.bf16.vlgmr.msra.gmra.mxu0 %v3861_v5 }
 0x288   :  { %v4176_v40 = vpop.f32.mrf.mxu0 }
 0x28a   :  { %v4177_v58 = vpop.f32.mrf.mxu0 }
 0x28b   :  { %v4178_v62 = vadd.f32 %v4177_v58, %v4176_v40 }
 0x28c   :  { %v4179_v53 = vpop.f32.mrf.mxu0 }
 0x28d   :  { %v4033_v41 = vadd.f32 %v4178_v62, %v4137_v32 }
 0x28e   :  { %v4180_v61 = vpop.f32.mrf.mxu0 }
 0x28f   :  { %v4038_v57 = vmax.f32 %v4033_v41, 0.0 }
 0x291   :  { %v4039_v38 = vpack.c.bf16 %v4038_v57, %v4038_v57 }
 0x293   :  { %4156 = vmatmul.mubr.msk.bf16.vlgmr.msra.gmra.mxu1 %vm4064_vm0, %v4039_v38 }
 0x353   :  { %v4102_v45 = vpop.f32.mrf.mxu1 }
 0x354   :  { %v4103_v44 = vadd.f32 %v4102_v45, %v4047_v39 }
 0x355   :  { %v4104_v13 = vpop.f32.mrf.mxu1 }
 0x356   :  { %v4157_v12 = vmul.f32 -1.442695, %v4103_v44  ;;  %v4105_v29 = vadd.f32 %v4104_v13, %v4051_v1 }
 0x357   :  { %v4106_v52 = vpop.f32.mrf.mxu1 }
 0x358   :  { %4210 = vpow2.f32 %v4157_v12  ;;  %v4158_v63 = vmul.f32 -1.442695, %v4105_v29 }
 0x359   :  { %v4107_v35 = vpop.f32.mrf.mxu1 }
 0x35a   :  { %4212 = vpow2.f32 %v4158_v63 }
 0x365   :  { %v4211_v15 = vpop.eup %4210 }
 0x366   :  { %v4115_v50 = vadd.f32 1.0, %v4211_v15 }
 0x367   :  { %v4213_v24 = vpop.eup %4212 }
 0x368   :  { %v4116_v43 = vadd.f32 1.0, %v4213_v24  ;;  %4214 = vrcp.f32 %v4115_v50 }
 0x36a   :  { %4216 = vrcp.f32 %v4116_v43 }
 0x375   :  { %v4215_v49 = vpop.eup %4214 }
 0x377   :  { %v4217_v10 = vpop.eup %4216 }
 0x378   :  { %v4123_v17 = vcombine.low %v4215_v49, %v4217_v10 }
 0x37a   :  { %4159 = vst.sshfl [vmem:[%s5777_s5] sm:$0x33 pattern:$0x76325410] %v4123_v17 }

</bundles_post_ra>
